<compile_context>
chip_gen: v7x
topology: tpu7x:2x2x1
jax: 0.10.0
libtpu: 0.0.40
codegen_flags: <defaults>
</compile_context>

<pallas_src>
import jax
import jax.numpy as jnp
from jax.experimental import pallas as pl
from jax.experimental.pallas import tpu as pltpu
import numpy as np

reducelist = {64: 32, 256: 16, 512: 32, 1024: 64, 2048: 128}


def _se_gate(x, fc1_t, b1, fc2_t, b2):
    """Squeeze-and-excite gating on a (NB, C, HW) block."""
    hw = x.shape[-1]
    pooled = jnp.sum(x, axis=-1) * (1.0 / hw)                       # (NB, C)  lane reduce (XLU)
    h = jnp.dot(pooled, fc1_t, preferred_element_type=jnp.float32) + b1
    h = jnp.maximum(h, 0.0)
    w = jnp.dot(h, fc2_t, preferred_element_type=jnp.float32) + b2
    w = jax.nn.sigmoid(w)                                           # (NB, C)
    return x * w[:, :, None]                                        # broadcast over HW lanes


def _se_fusion_kernel(rgb_ref, dep_ref,
                      rf1_ref, rb1_ref, rf2_ref, rb2_ref,
                      df1_ref, db1_ref, df2_ref, db2_ref,
                      out_ref, rgbse_ref, depse_ref):
    rgb_se = _se_gate(rgb_ref[...], rf1_ref[...], rb1_ref[...], rf2_ref[...], rb2_ref[...])
    dep_se = _se_gate(dep_ref[...], df1_ref[...], db1_ref[...], df2_ref[...], db2_ref[...])
    rgbse_ref[...] = rgb_se
    depse_ref[...] = dep_se
    out_ref[...] = rgb_se + dep_se


def _se_fusion_align_kernel(rgb_ref, dep_ref,
                            rf1_ref, rb1_ref, rf2_ref, rb2_ref,
                            df1_ref, db1_ref, df2_ref, db2_ref,
                            aw_ref,
                            out_ref, rgbse_ref, depse_ref):
    rgb_se = _se_gate(rgb_ref[...], rf1_ref[...], rb1_ref[...], rf2_ref[...], rb2_ref[...])
    dep_se = _se_gate(dep_ref[...], df1_ref[...], db1_ref[...], df2_ref[...], db2_ref[...])
    rgbse_ref[...] = rgb_se
    depse_ref[...] = dep_se
    aw = aw_ref[...]                                                # (C_rgb, C_dep), 1x1 conv, no bias
    nb = rgb_ref.shape[0]
    for n in range(nb):                                             # static unroll, NB is small
        aligned = jnp.dot(aw, dep_se[n], preferred_element_type=jnp.float32)   # MXU (C_rgb, HW)
        out_ref[n] = rgb_se[n] + aligned


def _pick_block_batch(n, c_rgb, c_dep, hw, budget_bytes=8 * 1024 * 1024):
    # in (rgb+dep) + out (out+rgb_se+dep_se), f32, double-buffered by the pipeline
    per_img = (3 * c_rgb + 2 * c_dep) * hw * 4 * 2
    nb = int(max(1, min(n, budget_bytes // max(per_img, 1))))
    while n % nb != 0:
        nb -= 1
    return nb


def se_fusion_add_forward(rgb, depth, params):
    """rgb: (N, C_rgb, H, W), depth: (N, C_dep, H, W) -> (out, rgb_se, dep_se) in NCHW."""
    N, C_r, H, W = rgb.shape
    _, C_d, H2, W2 = depth.shape
    assert (H, W) == (H2, W2)
    HW = H * W

    # Free reshapes only (no transpose): keep NCHW, put H*W on the lane axis.
    rgb_f = rgb.reshape(N, C_r, HW).astype(jnp.float32)
    dep_f = depth.reshape(N, C_d, HW).astype(jnp.float32)

    rf1_t = params["rgb_fc1_w"].T.astype(jnp.float32)               # (C_r, hd_r)
    rb1 = params["rgb_fc1_b"].reshape(1, -1).astype(jnp.float32)    # (1, hd_r)
    rf2_t = params["rgb_fc2_w"].T.astype(jnp.float32)               # (hd_r, C_r)
    rb2 = params["rgb_fc2_b"].reshape(1, -1).astype(jnp.float32)    # (1, C_r)
    df1_t = params["dep_fc1_w"].T.astype(jnp.float32)
    db1 = params["dep_fc1_b"].reshape(1, -1).astype(jnp.float32)
    df2_t = params["dep_fc2_w"].T.astype(jnp.float32)
    db2 = params["dep_fc2_b"].reshape(1, -1).astype(jnp.float32)
    align_w = params.get("align_w", None)

    NB = _pick_block_batch(N, C_r, C_d, HW)
    grid = (N // NB,)

    img_spec_r = pl.BlockSpec((NB, C_r, HW), lambda n: (n, 0, 0))
    img_spec_d = pl.BlockSpec((NB, C_d, HW), lambda n: (n, 0, 0))

    def full(arr):  # whole small weight array resident in VMEM for every grid step
        return pl.BlockSpec(arr.shape, lambda n: (0,) * arr.ndim)

    inputs = [rgb_f, dep_f, rf1_t, rb1, rf2_t, rb2, df1_t, db1, df2_t, db2]
    in_specs = [img_spec_r, img_spec_d] + [full(a) for a in inputs[2:]]

    if align_w is not None:
        aw = align_w.astype(jnp.float32)
        inputs = inputs + [aw]
        in_specs = in_specs + [full(aw)]
        kernel = _se_fusion_align_kernel
    else:
        kernel = _se_fusion_kernel

    out_shape = (
        jax.ShapeDtypeStruct((N, C_r, HW), jnp.float32),            # out
        jax.ShapeDtypeStruct((N, C_r, HW), jnp.float32),            # rgb_se
        jax.ShapeDtypeStruct((N, C_d, HW), jnp.float32),            # dep_se
    )
    out_specs = (img_spec_r, img_spec_r, img_spec_d)

    out, rgb_se, dep_se = pl.pallas_call(
        kernel,
        out_shape=out_shape,
        grid=grid,
        in_specs=in_specs,
        out_specs=out_specs,
        compiler_params=pltpu.CompilerParams(dimension_semantics=("parallel",)),
    )(*inputs)

    return (out.reshape(N, C_r, H, W),
            rgb_se.reshape(N, C_r, H, W),
            dep_se.reshape(N, C_d, H, W))


# ---------------- pure-JAX reference (mirrors the PyTorch forward) ----------------

def _se_reference(x, fc1_w, fc1_b, fc2_w, fc2_b):
    p = jnp.mean(x, axis=(2, 3))                                    # adaptive_avg_pool2d(x, 1)
    h = jnp.maximum(p @ fc1_w.T + fc1_b, 0.0)
    w = jax.nn.sigmoid(h @ fc2_w.T + fc2_b)
    return x * w[:, :, None, None]


def se_fusion_add_reference(rgb, depth, params):
    rgb_se = _se_reference(rgb, params["rgb_fc1_w"], params["rgb_fc1_b"],
                           params["rgb_fc2_w"], params["rgb_fc2_b"])
    dep_se = _se_reference(depth, params["dep_fc1_w"], params["dep_fc1_b"],
                           params["dep_fc2_w"], params["dep_fc2_b"])
    if params.get("align_w", None) is not None:
        out = rgb_se + jnp.einsum("oi,nihw->nohw", params["align_w"], dep_se)
    else:
        out = rgb_se + dep_se
    return out, rgb_se, dep_se


if __name__ == "__main__":
    key = jax.random.PRNGKey(0)

    def make_params(k, c_rgb, c_dep):
        hd_r = c_rgb // reducelist[c_rgb]   # se_rgb: reduction from reducelist
        hd_d = c_dep // 4                   # se_depth: default reduction=4
        ks = jax.random.split(k, 9)
        p = {
            "rgb_fc1_w": jax.random.normal(ks[0], (hd_r, c_rgb), jnp.float32) * 0.1,
            "rgb_fc1_b": jax.random.normal(ks[1], (hd_r,), jnp.float32) * 0.1,
            "rgb_fc2_w": jax.random.normal(ks[2], (c_rgb, hd_r), jnp.float32) * 0.1,
            "rgb_fc2_b": jax.random.normal(ks[3], (c_rgb,), jnp.float32) * 0.1,
            "dep_fc1_w": jax.random.normal(ks[4], (hd_d, c_dep), jnp.float32) * 0.1,
            "dep_fc1_b": jax.random.normal(ks[5], (hd_d,), jnp.float32) * 0.1,
            "dep_fc2_w": jax.random.normal(ks[6], (c_dep, hd_d), jnp.float32) * 0.1,
            "dep_fc2_b": jax.random.normal(ks[7], (c_dep,), jnp.float32) * 0.1,
        }
        if c_rgb != c_dep:                  # conv1x1(channels_in_depth, channels_in_rgb), bias=False
            p["align_w"] = jax.random.normal(ks[8], (c_rgb, c_dep), jnp.float32) * 0.1
        return p

    N, H, W = 2, 16, 16
    # (C_rgb, C_depth): equal-channel add path, and the alignconv path.
    configs = [(64, 64), (64, 32)]

    for (c_rgb, c_dep) in configs:
        kp, kr, kd = jax.random.split(jax.random.fold_in(key, c_rgb * 1000 + c_dep), 3)
        params = make_params(kp, c_rgb, c_dep)
        rgb = jax.random.normal(kr, (N, c_rgb, H, W), jnp.float32)
        depth = jax.random.normal(kd, (N, c_dep, H, W), jnp.float32)

        got = jax.block_until_ready(se_fusion_add_forward(rgb, depth, params))
        ref = jax.block_until_ready(se_fusion_add_reference(rgb, depth, params))
        for g, r in zip(got, ref):
            np.testing.assert_allclose(np.asarray(g), np.asarray(r), rtol=2e-3, atol=2e-3)

    print("KERNEL_OK")
</pallas_src>

<mosaic_0001>
module attributes {stable_mosaic.version = 11 : i64} {
  func.func @_se_fusion_kernel(%arg0: i32, %arg1: memref<2x64x256xf32, #tpu.memory_space<vmem>>, %arg2: memref<2x64x256xf32, #tpu.memory_space<vmem>>, %arg3: memref<64x2xf32, #tpu.memory_space<vmem>>, %arg4: memref<1x2xf32, #tpu.memory_space<vmem>>, %arg5: memref<2x64xf32, #tpu.memory_space<vmem>>, %arg6: memref<1x64xf32, #tpu.memory_space<vmem>>, %arg7: memref<64x16xf32, #tpu.memory_space<vmem>>, %arg8: memref<1x16xf32, #tpu.memory_space<vmem>>, %arg9: memref<16x64xf32, #tpu.memory_space<vmem>>, %arg10: memref<1x64xf32, #tpu.memory_space<vmem>>, %arg11: memref<2x64x256xf32, #tpu.memory_space<vmem>>, %arg12: memref<2x64x256xf32, #tpu.memory_space<vmem>>, %arg13: memref<2x64x256xf32, #tpu.memory_space<vmem>>) attributes {dimension_semantics = [#tpu.dimension_semantics<parallel>], iteration_bounds = array<i64: 1>, scalar_prefetch = 0 : i64, scratch_operands = 0 : i64, tpu.core_type = #tpu.core_type<tc>, window_params = [{transform_indices = @transform_0, window_bounds = array<i64: 2, 64, 256>}, {transform_indices = @transform_1, window_bounds = array<i64: 2, 64, 256>}, {pipeline_mode = #tpu.pipeline_mode<synchronous>, transform_indices = @transform_2, window_bounds = array<i64: 64, 2>}, {pipeline_mode = #tpu.pipeline_mode<synchronous>, transform_indices = @transform_3, window_bounds = array<i64: 1, 2>}, {pipeline_mode = #tpu.pipeline_mode<synchronous>, transform_indices = @transform_4, window_bounds = array<i64: 2, 64>}, {pipeline_mode = #tpu.pipeline_mode<synchronous>, transform_indices = @transform_5, window_bounds = array<i64: 1, 64>}, {pipeline_mode = #tpu.pipeline_mode<synchronous>, transform_indices = @transform_6, window_bounds = array<i64: 64, 16>}, {pipeline_mode = #tpu.pipeline_mode<synchronous>, transform_indices = @transform_7, window_bounds = array<i64: 1, 16>}, {pipeline_mode = #tpu.pipeline_mode<synchronous>, transform_indices = @transform_8, window_bounds = array<i64: 16, 64>}, {pipeline_mode = #tpu.pipeline_mode<synchronous>, transform_indices = @transform_9, window_bounds = array<i64: 1, 64>}, {transform_indices = @transform_10, window_bounds = array<i64: 2, 64, 256>}, {transform_indices = @transform_11, window_bounds = array<i64: 2, 64, 256>}, {transform_indices = @transform_12, window_bounds = array<i64: 2, 64, 256>}]} {
    %c0 = arith.constant 0 : index
    %c0_0 = arith.constant 0 : index
    %c0_1 = arith.constant 0 : index
    %0 = vector.load %arg1[%c0, %c0_0, %c0_1] : memref<2x64x256xf32, #tpu.memory_space<vmem>>, vector<2x64x256xf32>
    %c0_2 = arith.constant 0 : index
    %c0_3 = arith.constant 0 : index
    %1 = vector.load %arg3[%c0_2, %c0_3] : memref<64x2xf32, #tpu.memory_space<vmem>>, vector<64x2xf32>
    %c0_4 = arith.constant 0 : index
    %c0_5 = arith.constant 0 : index
    %2 = vector.load %arg4[%c0_4, %c0_5] : memref<1x2xf32, #tpu.memory_space<vmem>>, vector<1x2xf32>
    %c0_6 = arith.constant 0 : index
    %c0_7 = arith.constant 0 : index
    %3 = vector.load %arg5[%c0_6, %c0_7] : memref<2x64xf32, #tpu.memory_space<vmem>>, vector<2x64xf32>
    %c0_8 = arith.constant 0 : index
    %c0_9 = arith.constant 0 : index
    %4 = vector.load %arg6[%c0_8, %c0_9] : memref<1x64xf32, #tpu.memory_space<vmem>>, vector<1x64xf32>
    %cst = arith.constant dense<0.000000e+00> : vector<2x64xf32>
    %5 = vector.multi_reduction <add>, %0, %cst [2] : vector<2x64x256xf32> to vector<2x64xf32>
    %cst_10 = arith.constant 3.906250e-03 : f32
    %6 = vector.broadcast %cst_10 : f32 to vector<2x64xf32>
    %7 = arith.mulf %5, %6 : vector<2x64xf32>
    %cst_11 = arith.constant dense<0.000000e+00> : vector<2x2xf32>
    %8 = tpu.matmul %7, %1, %cst_11 {dimension_numbers = #tpu.dot_dimension_numbers<[1], [0], [0], [1], [0, 0, 1, 1], [], []>} : vector<2x64xf32>, vector<64x2xf32>, vector<2x2xf32> -> vector<2x2xf32>
    %9 = vector.broadcast %2 : vector<1x2xf32> to vector<2x2xf32>
    %10 = arith.addf %8, %9 : vector<2x2xf32>
    %cst_12 = arith.constant 0.000000e+00 : f32
    %11 = vector.broadcast %cst_12 : f32 to vector<2x2xf32>
    %12 = arith.maximumf %10, %11 : vector<2x2xf32>
    %cst_13 = arith.constant dense<0.000000e+00> : vector<2x64xf32>
    %13 = tpu.matmul %12, %3, %cst_13 {dimension_numbers = #tpu.dot_dimension_numbers<[1], [0], [0], [1], [0, 0, 1, 1], [], []>} : vector<2x2xf32>, vector<2x64xf32>, vector<2x64xf32> -> vector<2x64xf32>
    %14 = vector.broadcast %4 : vector<1x64xf32> to vector<2x64xf32>
    %15 = arith.addf %13, %14 : vector<2x64xf32>
    %16 = arith.negf %15 : vector<2x64xf32>
    %17 = math.exp %16 : vector<2x64xf32>
    %cst_14 = arith.constant 1.000000e+00 : f32
    %18 = vector.broadcast %cst_14 : f32 to vector<2x64xf32>
    %19 = arith.addf %18, %17 : vector<2x64xf32>
    %20 = arith.divf %18, %19 : vector<2x64xf32>
    %21 = vector.shape_cast %20 : vector<2x64xf32> to vector<2x64x1xf32>
    %22 = vector.broadcast %21 : vector<2x64x1xf32> to vector<2x64x256xf32>
    %23 = arith.mulf %0, %22 : vector<2x64x256xf32>
    %c0_15 = arith.constant 0 : index
    %c0_16 = arith.constant 0 : index
    %c0_17 = arith.constant 0 : index
    %24 = vector.load %arg2[%c0_15, %c0_16, %c0_17] : memref<2x64x256xf32, #tpu.memory_space<vmem>>, vector<2x64x256xf32>
    %c0_18 = arith.constant 0 : index
    %c0_19 = arith.constant 0 : index
    %25 = vector.load %arg7[%c0_18, %c0_19] : memref<64x16xf32, #tpu.memory_space<vmem>>, vector<64x16xf32>
    %c0_20 = arith.constant 0 : index
    %c0_21 = arith.constant 0 : index
    %26 = vector.load %arg8[%c0_20, %c0_21] : memref<1x16xf32, #tpu.memory_space<vmem>>, vector<1x16xf32>
    %c0_22 = arith.constant 0 : index
    %c0_23 = arith.constant 0 : index
    %27 = vector.load %arg9[%c0_22, %c0_23] : memref<16x64xf32, #tpu.memory_space<vmem>>, vector<16x64xf32>
    %c0_24 = arith.constant 0 : index
    %c0_25 = arith.constant 0 : index
    %28 = vector.load %arg10[%c0_24, %c0_25] : memref<1x64xf32, #tpu.memory_space<vmem>>, vector<1x64xf32>
    %cst_26 = arith.constant dense<0.000000e+00> : vector<2x64xf32>
    %29 = vector.multi_reduction <add>, %24, %cst_26 [2] : vector<2x64x256xf32> to vector<2x64xf32>
    %cst_27 = arith.constant 3.906250e-03 : f32
    %30 = vector.broadcast %cst_27 : f32 to vector<2x64xf32>
    %31 = arith.mulf %29, %30 : vector<2x64xf32>
    %cst_28 = arith.constant dense<0.000000e+00> : vector<2x16xf32>
    %32 = tpu.matmul %31, %25, %cst_28 {dimension_numbers = #tpu.dot_dimension_numbers<[1], [0], [0], [1], [0, 0, 1, 1], [], []>} : vector<2x64xf32>, vector<64x16xf32>, vector<2x16xf32> -> vector<2x16xf32>
    %33 = vector.broadcast %26 : vector<1x16xf32> to vector<2x16xf32>
    %34 = arith.addf %32, %33 : vector<2x16xf32>
    %cst_29 = arith.constant 0.000000e+00 : f32
    %35 = vector.broadcast %cst_29 : f32 to vector<2x16xf32>
    %36 = arith.maximumf %34, %35 : vector<2x16xf32>
    %cst_30 = arith.constant dense<0.000000e+00> : vector<2x64xf32>
    %37 = tpu.matmul %36, %27, %cst_30 {dimension_numbers = #tpu.dot_dimension_numbers<[1], [0], [0], [1], [0, 0, 1, 1], [], []>} : vector<2x16xf32>, vector<16x64xf32>, vector<2x64xf32> -> vector<2x64xf32>
    %38 = vector.broadcast %28 : vector<1x64xf32> to vector<2x64xf32>
    %39 = arith.addf %37, %38 : vector<2x64xf32>
    %40 = arith.negf %39 : vector<2x64xf32>
    %41 = math.exp %40 : vector<2x64xf32>
    %cst_31 = arith.constant 1.000000e+00 : f32
    %42 = vector.broadcast %cst_31 : f32 to vector<2x64xf32>
    %43 = arith.addf %42, %41 : vector<2x64xf32>
    %44 = arith.divf %42, %43 : vector<2x64xf32>
    %45 = vector.shape_cast %44 : vector<2x64xf32> to vector<2x64x1xf32>
    %46 = vector.broadcast %45 : vector<2x64x1xf32> to vector<2x64x256xf32>
    %47 = arith.mulf %24, %46 : vector<2x64x256xf32>
    %c0_32 = arith.constant 0 : index
    %c0_33 = arith.constant 0 : index
    %c0_34 = arith.constant 0 : index
    %48 = vector.load %arg12[%c0_32, %c0_33, %c0_34] : memref<2x64x256xf32, #tpu.memory_space<vmem>>, vector<2x64x256xf32>
    tpu.vector_store %arg12[%c0_32, %c0_33, %c0_34], %23 {strides = array<i32>} : memref<2x64x256xf32, #tpu.memory_space<vmem>>, vector<2x64x256xf32>,
    %c0_35 = arith.constant 0 : index
    %c0_36 = arith.constant 0 : index
    %c0_37 = arith.constant 0 : index
    %49 = vector.load %arg13[%c0_35, %c0_36, %c0_37] : memref<2x64x256xf32, #tpu.memory_space<vmem>>, vector<2x64x256xf32>
    tpu.vector_store %arg13[%c0_35, %c0_36, %c0_37], %47 {strides = array<i32>} : memref<2x64x256xf32, #tpu.memory_space<vmem>>, vector<2x64x256xf32>,
    %50 = arith.addf %23, %47 : vector<2x64x256xf32>
    %c0_38 = arith.constant 0 : index
    %c0_39 = arith.constant 0 : index
    %c0_40 = arith.constant 0 : index
    %51 = vector.load %arg11[%c0_38, %c0_39, %c0_40] : memref<2x64x256xf32, #tpu.memory_space<vmem>>, vector<2x64x256xf32>
    tpu.vector_store %arg11[%c0_38, %c0_39, %c0_40], %50 {strides = array<i32>} : memref<2x64x256xf32, #tpu.memory_space<vmem>>, vector<2x64x256xf32>,
    return
  }
  func.func @transform_0(%arg0: i32) -> (i32, i32, i32) {
    %c0_i32 = arith.constant 0 : i32
    %c0_i32_0 = arith.constant 0 : i32
    %c0_i32_1 = arith.constant 0 : i32
    return %arg0, %c0_i32, %c0_i32_0 : i32, i32, i32
  }
  func.func @transform_1(%arg0: i32) -> (i32, i32, i32) {
    %c0_i32 = arith.constant 0 : i32
    %c0_i32_0 = arith.constant 0 : i32
    %c0_i32_1 = arith.constant 0 : i32
    return %arg0, %c0_i32, %c0_i32_0 : i32, i32, i32
  }
  func.func @transform_2(%arg0: i32) -> (i32, i32) {
    %c0_i32 = arith.constant 0 : i32
    %c0_i32_0 = arith.constant 0 : i32
    %c0_i32_1 = arith.constant 0 : i32
    return %c0_i32, %c0_i32_0 : i32, i32
  }
  func.func @transform_3(%arg0: i32) -> (i32, i32) {
    %c0_i32 = arith.constant 0 : i32
    %c0_i32_0 = arith.constant 0 : i32
    %c0_i32_1 = arith.constant 0 : i32
    return %c0_i32, %c0_i32_0 : i32, i32
  }
  func.func @transform_4(%arg0: i32) -> (i32, i32) {
    %c0_i32 = arith.constant 0 : i32
    %c0_i32_0 = arith.constant 0 : i32
    %c0_i32_1 = arith.constant 0 : i32
    return %c0_i32, %c0_i32_0 : i32, i32
  }
  func.func @transform_5(%arg0: i32) -> (i32, i32) {
    %c0_i32 = arith.constant 0 : i32
    %c0_i32_0 = arith.constant 0 : i32
    %c0_i32_1 = arith.constant 0 : i32
    return %c0_i32, %c0_i32_0 : i32, i32
  }
  func.func @transform_6(%arg0: i32) -> (i32, i32) {
    %c0_i32 = arith.constant 0 : i32
    %c0_i32_0 = arith.constant 0 : i32
    %c0_i32_1 = arith.constant 0 : i32
    return %c0_i32, %c0_i32_0 : i32, i32
  }
  func.func @transform_7(%arg0: i32) -> (i32, i32) {
    %c0_i32 = arith.constant 0 : i32
    %c0_i32_0 = arith.constant 0 : i32
    %c0_i32_1 = arith.constant 0 : i32
    return %c0_i32, %c0_i32_0 : i32, i32
  }
  func.func @transform_8(%arg0: i32) -> (i32, i32) {
    %c0_i32 = arith.constant 0 : i32
    %c0_i32_0 = arith.constant 0 : i32
    %c0_i32_1 = arith.constant 0 : i32
    return %c0_i32, %c0_i32_0 : i32, i32
  }
  func.func @transform_9(%arg0: i32) -> (i32, i32) {
    %c0_i32 = arith.constant 0 : i32
    %c0_i32_0 = arith.constant 0 : i32
    %c0_i32_1 = arith.constant 0 : i32
    return %c0_i32, %c0_i32_0 : i32, i32
  }
  func.func @transform_10(%arg0: i32) -> (i32, i32, i32) {
    %c0_i32 = arith.constant 0 : i32
    %c0_i32_0 = arith.constant 0 : i32
    %c0_i32_1 = arith.constant 0 : i32
    return %arg0, %c0_i32, %c0_i32_0 : i32, i32, i32
  }
  func.func @transform_11(%arg0: i32) -> (i32, i32, i32) {
    %c0_i32 = arith.constant 0 : i32
    %c0_i32_0 = arith.constant 0 : i32
    %c0_i32_1 = arith.constant 0 : i32
    return %arg0, %c0_i32, %c0_i32_0 : i32, i32, i32
  }
  func.func @transform_12(%arg0: i32) -> (i32, i32, i32) {
    %c0_i32 = arith.constant 0 : i32
    %c0_i32_0 = arith.constant 0 : i32
    %c0_i32_1 = arith.constant 0 : i32
    return %arg0, %c0_i32, %c0_i32_0 : i32, i32, i32
  }
}

</mosaic_0001>

<bundles_post_ra>
// kernel: tpu_custom_call.1
= control target key start
LH: loop header
LB: loop body
LE: loop exit
PB: predicated region body
PF: predicated region fallthrough
CT: control target
= control target key end

     0   :  { %18 = vsyncpa [#allocation3], 0  ;;  %s2181_s0 = inlined_call_operand.hbm [shape: f32[2,64,256], index: 0, kind: input, shape index: {}]   ;;  %s2182_s1 = inlined_call_operand.hbm [shape: f32[2,64,256], index: 1, kind: input, shape index: {}]   ;;  %s2183_s2 = inlined_call_operand.vmem [shape: f32[64,2], index: 2, kind: input, shape index: {}]   ;;  %s2184_s3 = inlined_call_operand.vmem [shape: f32[1,2], index: 3, kind: input, shape index: {}]   ;;  %s2185_s4 = inlined_call_operand.vmem [shape: f32[2,64], index: 4, kind: input, shape index: {}]   ;;  %s2186_s5 = inlined_call_operand.vmem [shape: f32[1,64], index: 5, kind: input, shape index: {}]   ;;  %s2187_s6 = inlined_call_operand.vmem [shape: f32[64,16], index: 6, kind: input, shape index: {}]   ;;  %s2188_s7 = inlined_call_operand.vmem [shape: f32[1,16], index: 7, kind: input, shape index: {}]   ;;  %s2189_s8 = inlined_call_operand.vmem [shape: f32[16,64], index: 8, kind: input, shape index: {}]   ;;  %s2190_s9 = inlined_call_operand.vmem [shape: f32[1,64], index: 9, kind: input, shape index: {}]   ;;  %s2191_s10 = inlined_call_operand.hbm [shape: f32[2,64,256], index: 10, kind: output, shape index: {0}]   ;;  %s2192_s11 = inlined_call_operand.hbm [shape: f32[2,64,256], index: 11, kind: output, shape index: {1}]   ;;  %s2193_s12 = inlined_call_operand.hbm [shape: f32[2,64,256], index: 12, kind: output, shape index: {2}]  }
   0x1   :  { %19 = vsyncpa [#allocation6], 0 }
   0x2   :  { %20 = vsyncpa [#allocation4], 0 }
   0x3   :  { %21 = vsyncpa [#allocation9], 0  ;;  %s1453_s21 = smov [#allocation2]   ;;  %s1335_s25 = scalar_lea.hbm %s2181_s0, 4096 }
   0x4   :  { %s27_s22 = sshll.u32 %s1453_s21, 4  ;;  %p1336_p0 = scmp.ne.s32.totalorder %s2181_s0, %s1335_s25  ;;  %s28_s22 = int_to_ptr.vmem [resolvable:$true] %s27_s22 }
   0x5   :  { %p1339_p1 = scmp.lt.u32.totalorder %s1335_s25, %s2181_s0 }
   0x7   :  { %p1341_p2 = pnand %p1339_p1, %p1336_p0 }
   0x9   :  { %1344 = shalt.err (!%p1341_p2)
}
   0xa   :  { %s1345_s30 = scalar_lea.vmem %s28_s22, 4096  ;;  %p1350_p4 = scmp.lt.s32.totalorder %s28_s22, %s28_s22 }
   0xb   :  { %p1346_p3 = scmp.ne.s32.totalorder %s28_s22, %s1345_s30  ;;  %p1351_p5 = scmp.lt.s32.totalorder %s1345_s30, %s1345_s30 }
   0xd   :  { %p1352_p6 = por %p1351_p5, %p1350_p4 }
   0xf   :  { %p1353_p7 = pnand %p1352_p6, %p1346_p3 }
  0x11   :  { %1356 = shalt.err (!%p1353_p7)
}
  0x12   :  { %s1454_s13 = smov 256   ;;  %s1455_s14 = smov 16  }
  0x13   :  { %33 = dma.hbm_to_vmem [thread:$0]  %s2181_s0, 4096, %s28_s22, [#allocation3], %s1454_s13, %s1454_s13, %s1455_s14  }
  0x14   :  { %s1456_s17 = smov [#allocation5]   ;;  %s1357_s21 = scalar_lea.hbm %s2182_s1, 4096 }
  0x15   :  { %s39_s18 = sshll.u32 %s1456_s17, 4  ;;  %p1358_p8 = scmp.ne.s32.totalorder %s2182_s1, %s1357_s21  ;;  %s40_s18 = int_to_ptr.vmem [resolvable:$true] %s39_s18 }
  0x16   :  { %p1361_p9 = scmp.lt.u32.totalorder %s1357_s21, %s2182_s1 }
  0x18   :  { %p1363_p10 = pnand %p1361_p9, %p1358_p8 }
  0x1a   :  { %1366 = shalt.err (!%p1363_p10)
}
  0x1b   :  { %s1367_s27 = scalar_lea.vmem %s40_s18, 4096  ;;  %p1372_p12 = scmp.lt.s32.totalorder %s40_s18, %s40_s18 }
  0x1c   :  { %p1368_p11 = scmp.ne.s32.totalorder %s40_s18, %s1367_s27  ;;  %p1373_p13 = scmp.lt.s32.totalorder %s1367_s27, %s1367_s27 }
  0x1e   :  { %p1374_p0 = por %p1373_p13, %p1372_p12 }
  0x20   :  { %p1375_p1 = pnand %p1374_p0, %p1368_p11 }
  0x22   :  { %1378 = shalt.err (!%p1375_p1)
}
  0x23   :  { %45 = dma.hbm_to_vmem [thread:$0]  %s2182_s1, 4096, %s40_s18, [#allocation6], %s1454_s13, %s1454_s13, %s1455_s14  }
  0x24   :  { %1445 = dma.done.wait [#allocation3], 4096  }
  0x25   :  { %1446 = vsyncadd [#allocation3], 4294963200 }
  0x26   :  { %1447 = dma.done.wait [#allocation6], 4096  }
  0x27   :  { %1448 = vsyncadd [#allocation6], 4294963200  ;;  %v1558_v0 = vld [vmem:[#allocation2 + $0x80] sm:$0xff]  ;;  %v1560_v1 = vld [vmem:[#allocation2 + $0x88] sm:$0xff]  ;;  %v2194_v51 = vmov 0.0|0.0   ;;  %vm1458_vm0 = vmmov 0  }
  0x28   :  { %v1562_v2 = vld [vmem:[#allocation2] sm:$0xff]  ;;  %v135_v3 = vadd.f32 %v1560_v1, %v1558_v0  ;;  %v1566_v4 = vld [vmem:[#allocation2 + $0x8] sm:$0xff]  ;;  %v1568_v5 = vld [vmem:[#allocation2 + $0x90] sm:$0xff]  ;;  %1290 = vmatprep.subr.bf16.mxu0 %v2194_v51  ;;  %v2196_v61 = vmov 0.0   ;;  %vm208_vm1 = vcmask 130112   ;;  %vm215_vm2 = vcmask 195712  }
  0x29   :  { %v1570_v6 = vld [vmem:[#allocation2 + $0x98] sm:$0xff]  ;;  %v111_v7 = vadd.f32 %v1566_v4, %v1562_v2  ;;  %v1574_v8 = vld [vmem:[#allocation2 + $0x10] sm:$0xff]  ;;  %v1582_v12 = vld [vmem:[#allocation2 + $0xa0] sm:$0xff]  ;;  %1256 = vmatprep.mubr.msk.f32.mxu0 %vm1458_vm0, %v2196_v61  ;;  %1259 = vmatprep.subr.mxu1 %v2196_v61  ;;  %vm222_vm3 = vcmask 261312   ;;  %vm229_vm4 = vcmask 326912   ;;  %vm236_vm5 = vcmask 392512  }
  0x2a   :  { %v1576_v9 = vld [vmem:[#allocation2 + $0x18] sm:$0xff]  ;;  %136 = vadd.xlane.f32.xlu1 %v135_v3  ;;  %v138_v10 = vadd.f32 %v1570_v6, %v1568_v5  ;;  %v1584_v13 = vld [vmem:[#allocation2 + $0xa8] sm:$0xff]  ;;  %v1586_v14 = vld [vmem:[#allocation2 + $0x20] sm:$0xff]  ;;  %1261 = vmatprep.mubr.msk.f32.mxu1 %vm1458_vm0, %v2196_v61  ;;  %vm243_vm6 = vcmask 458112   ;;  %vm250_vm7 = vcmask 523712   ;;  %vm291_vm8 = vcmask 1041409  }
  0x2b   :  { %112 = vadd.xlane.f32.xlu0 %v111_v7  ;;  %v114_v11 = vadd.f32 %v1576_v9, %v1574_v8  ;;  %v1588_v15 = vld [vmem:[#allocation2 + $0x28] sm:$0xff]  ;;  %v141_v16 = vadd.f32 %v1584_v13, %v1582_v12  ;;  %v1594_v18 = vld [vmem:[#allocation2 + $0xb0] sm:$0xff]  ;;  %v1596_v19 = vld [vmem:[#allocation2 + $0xb8] sm:$0xff]  ;;  %vm293_vm9 = vcmask 523264   ;;  %vm377_vm10 = vcmask 1041408  }
  0x2c   :  { %v117_v17 = vadd.f32 %v1588_v15, %v1586_v14  ;;  %v1598_v20 = vld [vmem:[#allocation2 + $0x30] sm:$0xff]  ;;  %v1600_v21 = vld [vmem:[#allocation2 + $0x38] sm:$0xff]  ;;  %v144_v22 = vadd.f32 %v1596_v19, %v1594_v18  ;;  %v1606_v24 = vld [vmem:[#allocation2 + $0xc0] sm:$0xff]  ;;  %vm373_vm11 = vcmask 15360   ;;  %vm847_vm12 = vcmask 130048  }
  0x2d   :  { %v120_v23 = vadd.f32 %v1600_v21, %v1598_v20  ;;  %v1608_v25 = vld [vmem:[#allocation2 + $0xc8] sm:$0xff]  ;;  %v1610_v26 = vld [vmem:[#allocation2 + $0x40] sm:$0xff]  ;;  %v1618_v30 = vld [vmem:[#allocation2 + $0xd0] sm:$0xff] }
  0x2e   :  { %139 = vadd.xlane.f32.xlu1 %v138_v10  ;;  %v1612_v27 = vld [vmem:[#allocation2 + $0x48] sm:$0xff]  ;;  %v147_v28 = vadd.f32 %v1608_v25, %v1606_v24  ;;  %v1620_v31 = vld [vmem:[#allocation2 + $0xd8] sm:$0xff]  ;;  %v1622_v32 = vld [vmem:[#allocation2 + $0x50] sm:$0xff] }
  0x2f   :  { %115 = vadd.xlane.f32.xlu0 %v114_v11  ;;  %v123_v29 = vadd.f32 %v1612_v27, %v1610_v26  ;;  %v1624_v33 = vld [vmem:[#allocation2 + $0x58] sm:$0xff]  ;;  %v150_v34 = vadd.f32 %v1620_v31, %v1618_v30  ;;  %v1630_v36 = vld [vmem:[#allocation2 + $0xe0] sm:$0xff]  ;;  %v1632_v37 = vld [vmem:[#allocation2 + $0xe8] sm:$0xff] }
  0x30   :  { %v126_v35 = vadd.f32 %v1624_v33, %v1622_v32  ;;  %v1634_v38 = vld [vmem:[#allocation2 + $0x60] sm:$0xff]  ;;  %v1636_v39 = vld [vmem:[#allocation2 + $0x68] sm:$0xff]  ;;  %v153_v40 = vadd.f32 %v1632_v37, %v1630_v36  ;;  %v1642_v42 = vld [vmem:[#allocation2 + $0xf0] sm:$0xff] }
  0x31   :  { %v129_v41 = vadd.f32 %v1636_v39, %v1634_v38  ;;  %2232 = vst [vmem:[#allocation15_spill] sm:$0xff] %v1642_v42  ;;  %v1644_v43 = vld [vmem:[#allocation2 + $0xf8] sm:$0xff]  ;;  %v1646_v44 = vld [vmem:[#allocation2 + $0x70] sm:$0xff]  ;;  %v100_v48 = vld [vmem:[%s2183_s2] sm:$0xff] }
  0x32   :  { %142 = vadd.xlane.f32.xlu1 %v141_v16  ;;  %2233 = vst [vmem:[#allocation16_spill] sm:$0xff] %v1644_v43  ;;  %v1648_v45 = vld [vmem:[#allocation2 + $0x78] sm:$0xff]  ;;  %v156_v46 = vadd.f32 %v1644_v43, %v1642_v42  ;;  %v101_v49 = vld [vmem:[%s2183_s2 + $0x8] sm:$0xff]  ;;  %v102_v52 = vld [vmem:[%s2183_s2 + $0x10] sm:$0xff] }
  0x33   :  { %118 = vadd.xlane.f32.xlu0 %v117_v17  ;;  %v132_v47 = vadd.f32 %v1648_v45, %v1646_v44  ;;  %v1291_v50 = vpack.c.bf16 %v101_v49, %v100_v48  ;;  %v103_v53 = vld [vmem:[%s2183_s2 + $0x18] sm:$0xff]  ;;  %v104_v55 = vld [vmem:[%s2183_s2 + $0x20] sm:$0xff]  ;;  %v105_v56 = vld [vmem:[%s2183_s2 + $0x28] sm:$0xff] }
  0x34   :  { %v1294_v54 = vpack.c.bf16 %v103_v53, %v102_v52  ;;  %v1297_v57 = vpack.c.bf16 %v105_v56, %v104_v55  ;;  %v106_v58 = vld [vmem:[%s2183_s2 + $0x30] sm:$0xff]  ;;  %v107_v59 = vld [vmem:[%s2183_s2 + $0x38] sm:$0xff]  ;;  %v1692_v3 = vld [vmem:[#allocation5] sm:$0xff] }
  0x35   :  { %1292 = vmatpush3.bf16.msra.mxu0 %v1291_v50  ;;  %v1300_v60 = vpack.c.bf16 %v107_v59, %v106_v58  ;;  %v1688_v62 = vld [vmem:[#allocation5 + $0x10] sm:$0xff]  ;;  %v1690_v63 = vld [vmem:[#allocation5 + $0x18] sm:$0xff]  ;;  %2236 = vst [vmem:[#allocation19_spill] sm:$0xff] %v1692_v3  ;;  %v1696_v10 = vld [vmem:[#allocation5 + $0x8] sm:$0xff] }
  0x36   :  { %145 = vadd.xlane.f32.xlu1 %v144_v22  ;;  %1293 = vmatprep.subr.bf16.mxu0 %v2194_v51  ;;  %2234 = vst [vmem:[#allocation17_spill] sm:$0xff] %v1688_v62  ;;  %2235 = vst [vmem:[#allocation18_spill] sm:$0xff] %v1690_v63  ;;  %v606_v7 = vadd.f32 %v1690_v63, %v1688_v62  ;;  %v1698_v11 = vld [vmem:[#allocation5 + $0x90] sm:$0xff]  ;;  %v1700_v16 = vld [vmem:[#allocation5 + $0x98] sm:$0xff]  ;;  %v603_v17 = vadd.f32 %v1696_v10, %v1692_v3 }
  0x37   :  { %121 = vadd.xlane.f32.xlu0 %v120_v23  ;;  %2237 = vst [vmem:[#allocation20_spill] sm:$0xff] %v1696_v10  ;;  %2238 = vst [vmem:[#allocation21_spill] sm:$0xff] %v1698_v11  ;;  %v1704_v22 = vld [vmem:[#allocation5 + $0x80] sm:$0xff]  ;;  %v1706_v23 = vld [vmem:[#allocation5 + $0x88] sm:$0xff] }
  0x38   :  { %2239 = vst [vmem:[#allocation22_spill] sm:$0xff] %v1700_v16  ;;  %2240 = vst [vmem:[#allocation23_spill] sm:$0xff] %v1704_v22  ;;  %v1724_v48 = vld [vmem:[#allocation5 + $0xb0] sm:$0xff]  ;;  %v1726_v49 = vld [vmem:[#allocation5 + $0xb8] sm:$0xff] }
  0x39   :  { %1295 = vmatpush3.bf16.msra.mxu0 %v1294_v54  ;;  %2241 = vst [vmem:[#allocation24_spill] sm:$0xff] %v1706_v23  ;;  %2246 = vst [vmem:[#allocation29_spill] sm:$0xff] %v1724_v48  ;;  %v1728_v50 = vld [vmem:[#allocation5 + $0x30] sm:$0xff]  ;;  %v1730_v52 = vld [vmem:[#allocation5 + $0x38] sm:$0xff]  ;;  %v636_v53 = vadd.f32 %v1726_v49, %v1724_v48 }
  0x3a   :  { %148 = vadd.xlane.f32.xlu1 %v147_v28  ;;  %1296 = vmatprep.subr.bf16.mxu0 %v2194_v51  ;;  %v630_v28 = vadd.f32 %v1700_v16, %v1698_v11  ;;  %2247 = vst [vmem:[#allocation30_spill] sm:$0xff] %v1726_v49  ;;  %2248 = vst [vmem:[#allocation31_spill] sm:$0xff] %v1728_v50  ;;  %v612_v54 = vadd.f32 %v1730_v52, %v1728_v50  ;;  %v1736_v55 = vld [vmem:[#allocation5 + $0xc0] sm:$0xff]  ;;  %v1738_v56 = vld [vmem:[#allocation5 + $0xc8] sm:$0xff]  ;;  %v197_v49 = vlaneseq }
  0x3b   :  { %124 = vadd.xlane.f32.xlu0 %v123_v29  ;;  %v627_v29 = vadd.f32 %v1706_v23, %v1704_v22  ;;  %2249 = vst [vmem:[#allocation32_spill] sm:$0xff] %v1730_v52  ;;  %2250 = vst [vmem:[#allocation33_spill] sm:$0xff] %v1736_v55  ;;  %v1742_v58 = vld [vmem:[#allocation5 + $0x48] sm:$0xff]  ;;  %v639_v59 = vadd.f32 %v1738_v56, %v1736_v55  ;;  %v1774_v55 = vld [vmem:[#allocation5 + $0xf8] sm:$0xff] }
  0x3c   :  { %2251 = vst [vmem:[#allocation34_spill] sm:$0xff] %v1738_v56  ;;  %2253 = vst [vmem:[#allocation36_spill] sm:$0xff] %v1742_v58  ;;  %v1766_v61 = vld [vmem:[#allocation5 + $0x68] sm:$0xff]  ;;  %v198_v22 = vand.u32 127, %v197_v49  ;;  %v1784_v11 = vshrl.u32 %v197_v49, 7 }
  0x3d   :  { %1298 = vmatpush3.bf16.msra.mxu0 %v1297_v57  ;;  %v1740_v57 = vld [vmem:[#allocation5 + $0x40] sm:$0xff]  ;;  %2261 = vst [vmem:[#allocation44_spill] sm:$0xff] %v1766_v61  ;;  %2263 = vst [vmem:[#allocation46_spill] sm:$0xff] %v1774_v55 }
  0x3e   :  { %151 = vadd.xlane.f32.xlu1 %v150_v34  ;;  %1299 = vmatprep.subr.bf16.mxu0 %v2194_v51  ;;  %v1712_v34 = vld [vmem:[#allocation5 + $0xa0] sm:$0xff]  ;;  %2252 = vst [vmem:[#allocation35_spill] sm:$0xff] %v1740_v57  ;;  %v238_v49 = vadd.s32 4294967248, %v198_v22  ;;  %v245_v43 = vadd.s32 4294967240, %v198_v22 }
  0x3f   :  { %127 = vadd.xlane.f32.xlu0 %v126_v35  ;;  %2242 = vst [vmem:[#allocation25_spill] sm:$0xff] %v1712_v34  ;;  %v1714_v35 = vld [vmem:[#allocation5 + $0xa8] sm:$0xff] }
  0x40   :  { %2243 = vst [vmem:[#allocation26_spill] sm:$0xff] %v1714_v35  ;;  %v1805_v62 = vsub.s32 %v238_v49, %v1784_v11 }
  0x41   :  { %1301 = vmatpush3.bf16.msra.mxu0 %v1300_v60  ;;  %v615_v60 = vadd.f32 %v1742_v58, %v1740_v57 }
  0x42   :  { %154 = vadd.xlane.f32.xlu1 %v153_v40  ;;  %1314 = vmatprep.subr.bf16.mxu0 %v2194_v51  ;;  %v1716_v40 = vld [vmem:[#allocation5 + $0x20] sm:$0xff] }
  0x43   :  { %130 = vadd.xlane.f32.xlu0 %v129_v41  ;;  %2244 = vst [vmem:[#allocation27_spill] sm:$0xff] %v1716_v40  ;;  %v1718_v41 = vld [vmem:[#allocation5 + $0x28] sm:$0xff]  ;;  %v1764_v51 = vld [vmem:[#allocation5 + $0x60] sm:$0xff] }
  0x44   :  { %2245 = vst [vmem:[#allocation28_spill] sm:$0xff] %v1718_v41  ;;  %2260 = vst [vmem:[#allocation43_spill] sm:$0xff] %v1764_v51 }
  0x46   :  { %157 = vadd.xlane.f32.xlu1 %v156_v46  ;;  %v633_v46 = vadd.f32 %v1714_v35, %v1712_v34 }
  0x47   :  { %133 = vadd.xlane.f32.xlu0 %v132_v47  ;;  %v609_v47 = vadd.f32 %v1718_v41, %v1716_v40 }
  0x4a   :  { %607 = vadd.xlane.f32.xlu1 %v606_v7  ;;  %v1748_v7 = vld [vmem:[#allocation5 + $0xd0] sm:$0xff] }
  0x4b   :  { %604 = vadd.xlane.f32.xlu0 %v603_v17  ;;  %2254 = vst [vmem:[#allocation37_spill] sm:$0xff] %v1748_v7  ;;  %v1750_v17 = vld [vmem:[#allocation5 + $0xd8] sm:$0xff] }
  0x4c   :  { %2255 = vst [vmem:[#allocation38_spill] sm:$0xff] %v1750_v17 }
  0x4e   :  { %631 = vadd.xlane.f32.xlu1 %v630_v28  ;;  %v1752_v28 = vld [vmem:[#allocation5 + $0x50] sm:$0xff] }
  0x4f   :  { %628 = vadd.xlane.f32.xlu0 %v627_v29  ;;  %2256 = vst [vmem:[#allocation39_spill] sm:$0xff] %v1752_v28  ;;  %v1754_v29 = vld [vmem:[#allocation5 + $0x58] sm:$0xff] }
  0x50   :  { %2257 = vst [vmem:[#allocation40_spill] sm:$0xff] %v1754_v29 }
  0x52   :  { %634 = vadd.xlane.f32.xlu1 %v633_v46  ;;  %v642_v46 = vadd.f32 %v1750_v17, %v1748_v7  ;;  %v1776_v17 = vld [vmem:[#allocation5 + $0x70] sm:$0xff]  ;;  %v1778_v7 = vld [vmem:[#allocation5 + $0x78] sm:$0xff] }
  0x53   :  { %610 = vadd.xlane.f32.xlu0 %v609_v47  ;;  %v618_v47 = vadd.f32 %v1754_v29, %v1752_v28  ;;  %2264 = vst [vmem:[#allocation47_spill] sm:$0xff] %v1776_v17  ;;  %2265 = vst [vmem:[#allocation48_spill] sm:$0xff] %v1778_v7 }
  0x56   :  { %637 = vadd.xlane.f32.xlu1 %v636_v53  ;;  %v1760_v53 = vld [vmem:[#allocation5 + $0xe0] sm:$0xff] }
  0x57   :  { %613 = vadd.xlane.f32.xlu0 %v612_v54  ;;  %2258 = vst [vmem:[#allocation41_spill] sm:$0xff] %v1760_v53  ;;  %v1762_v54 = vld [vmem:[#allocation5 + $0xe8] sm:$0xff] }
  0x58   :  { %2259 = vst [vmem:[#allocation42_spill] sm:$0xff] %v1762_v54  ;;  %v645_v56 = vadd.f32 %v1762_v54, %v1760_v53 }
  0x5a   :  { %640 = vadd.xlane.f32.xlu1 %v639_v59  ;;  %v621_v59 = vadd.f32 %v1766_v61, %v1764_v51  ;;  %v203_v61 = vadd.s32 4294967288, %v198_v22 }
  0x5b   :  { %616 = vadd.xlane.f32.xlu0 %v615_v60  ;;  %v1772_v60 = vld [vmem:[#allocation5 + $0xf0] sm:$0xff] }
  0x5c   :  { %2262 = vst [vmem:[#allocation45_spill] sm:$0xff] %v1772_v60  ;;  %v648_v35 = vadd.f32 %v1774_v55, %v1772_v60  ;;  %v210_v55 = vadd.s32 4294967280, %v198_v22  ;;  %v224_v60 = vadd.s32 4294967264, %v198_v22 }
  0x5e   :  { %643 = vadd.xlane.f32.xlu1 %v642_v46  ;;  %v624_v46 = vadd.f32 %v1778_v7, %v1776_v17  ;;  %v231_v7 = vadd.s32 4294967256, %v198_v22  ;;  %v1790_v17 = vsub.s32 %v203_v61, %v1784_v11  ;;  %v1793_v58 = vsub.s32 %v210_v55, %v1784_v11 }
  0x5f   :  { %619 = vadd.xlane.f32.xlu0 %v618_v47  ;;  %v1799_v28 = vsub.s32 %v224_v60, %v1784_v11 }
  0x60   :  { %v1802_v52 = vsub.s32 %v231_v7, %v1784_v11 }
  0x62   :  { %646 = vadd.xlane.f32.xlu1 %v645_v56 }
  0x63   :  { %622 = vadd.xlane.f32.xlu0 %v621_v59  ;;  %v217_v59 = vadd.s32 4294967272, %v198_v22 }
  0x65   :  { %v1796_v29 = vsub.s32 %v217_v59, %v1784_v11 }
  0x66   :  { %649 = vadd.xlane.f32.xlu1 %v648_v35  ;;  %v1787_v35 = vsub.s32 %v198_v22, %v1784_v11 }
  0x67   :  { %625 = vadd.xlane.f32.xlu0 %v624_v46 }
  0xb7   :  { %v137_v47 = vpop.xlane.xlu1 %136 }
  0xb8   :  { %v113_v54 = vpop.xlane.xlu0 %112  ;;  %v167_v50 = vmul.f32 0.00390625, %v137_v47 }
  0xbb   :  { %v140_v53 = vpop.xlane.xlu1 %139 }
  0xbc   :  { %v116_v34 = vpop.xlane.xlu0 %115  ;;  %v168_v57 = vmul.f32 0.00390625, %v140_v53  ;;  %v159_v53 = vmul.f32 0.00390625, %v113_v54 }
  0xbd   :  { %v160_v41 = vmul.f32 0.00390625, %v116_v34 }
  0xbe   :  { %v259_v60 = vrot.slane %v168_v57, %v1790_v17  ;;  %v202_v57 = vrot.slane %v159_v53, %v1787_v35 }
  0xbf   :  { %v143_v48 = vpop.xlane.xlu1 %142  ;;  %v207_v7 = vrot.slane %v160_v41, %v1790_v17 }
  0xc0   :  { %v119_v23 = vpop.xlane.xlu0 %118  ;;  %v169_v40 = vmul.f32 0.00390625, %v143_v48 }
  0xc1   :  { %v161_v55 = vmul.f32 0.00390625, %v119_v23  ;;  %v255_v23 = vrot.slane %v167_v50, %v1787_v35  ;;  %v1820_v50 = vsub.s32 %v245_v43, %v1784_v11 }
  0xc2   :  { %v264_v42 = vrot.slane %v169_v40, %v1793_v58 }
  0xc3   :  { %v146_v16 = vpop.xlane.xlu1 %145  ;;  %v214_v54 = vrot.slane %v161_v55, %v1793_v58  ;;  %v260_v40 = vsel %vm208_vm1, %v259_v60, %v255_v23 }
  0xc4   :  { %v122_v56 = vpop.xlane.xlu0 %121  ;;  %v170_v10 = vmul.f32 0.00390625, %v146_v16  ;;  %v265_v55 = vsel %vm215_vm2, %v264_v42, %v260_v40 }
  0xc5   :  { %v162_v63 = vmul.f32 0.00390625, %v122_v56 }
  0xc7   :  { %v149_v51 = vpop.xlane.xlu1 %148 }
  0xc8   :  { %v125_v46 = vpop.xlane.xlu0 %124  ;;  %v171_v59 = vmul.f32 0.00390625, %v149_v51  ;;  %v269_v51 = vrot.slane %v170_v10, %v1796_v29  ;;  %v209_v10 = vsel %vm208_vm1, %v207_v7, %v202_v57 }
  0xc9   :  { %v163_v34 = vmul.f32 0.00390625, %v125_v46  ;;  %v221_v46 = vrot.slane %v162_v63, %v1796_v29 }
  0xca   :  { %v274_v22 = vrot.slane %v171_v59, %v1799_v28  ;;  %v216_v59 = vsel %vm215_vm2, %v214_v54, %v209_v10  ;;  %v270_v60 = vsel %vm222_vm3, %v269_v51, %v265_v55 }
  0xcb   :  { %v152_v61 = vpop.xlane.xlu1 %151  ;;  %v223_v43 = vsel %vm222_vm3, %v221_v46, %v216_v59 }
  0xcc   :  { %v128_v3 = vpop.xlane.xlu0 %127  ;;  %v172_v48 = vmul.f32 0.00390625, %v152_v61 }
  0xcd   :  { %v164_v47 = vmul.f32 0.00390625, %v128_v3  ;;  %v228_v3 = vrot.slane %v163_v34, %v1799_v28 }
  0xce   :  { %v279_v61 = vrot.slane %v172_v48, %v1802_v52 }
  0xcf   :  { %v155_v16 = vpop.xlane.xlu1 %154  ;;  %v235_v53 = vrot.slane %v164_v47, %v1802_v52  ;;  %v230_v42 = vsel %vm229_vm4, %v228_v3, %v223_v43  ;;  %v2266_v3 = vmov 0.0  }
  0xd0   :  { %v173_v56 = vmul.f32 0.00390625, %v155_v16  ;;  %v131_v49 = vpop.xlane.xlu0 %130 }
  0xd1   :  { %v165_v41 = vmul.f32 0.00390625, %v131_v49  ;;  %v275_v49 = vsel %vm229_vm4, %v274_v22, %v270_v60  ;;  %v237_v54 = vsel %vm236_vm5, %v235_v53, %v230_v42 }
  0xd2   :  { %v284_v63 = vrot.slane %v173_v56, %v1805_v62  ;;  %v280_v47 = vsel %vm236_vm5, %v279_v61, %v275_v49 }
  0xd3   :  { %v158_v16 = vpop.xlane.xlu1 %157  ;;  %v242_v34 = vrot.slane %v165_v41, %v1805_v62 }
  0xd4   :  { %v174_v23 = vmul.f32 0.00390625, %v158_v16  ;;  %v134_v48 = vpop.xlane.xlu0 %133  ;;  %v285_v51 = vsel %vm243_vm6, %v284_v63, %v280_v47 }
  0xd5   :  { %v166_v7 = vmul.f32 0.00390625, %v134_v48  ;;  %v244_v41 = vsel %vm243_vm6, %v242_v34, %v237_v54 }
  0xd6   :  { %v289_v56 = vrot.slane %v174_v23, %v1820_v50 }
  0xd7   :  { %v249_v57 = vrot.slane %v166_v7, %v1820_v50  ;;  %v608_v61 = vpop.xlane.xlu1 %607 }
  0xd8   :  { %v290_v46 = vsel %vm250_vm7, %v289_v56, %v285_v51  ;;  %v652_v10 = vmul.f32 0.00390625, %v608_v61  ;;  %v605_v55 = vpop.xlane.xlu0 %604 }
  0xd9   :  { %v251_v22 = vsel %vm250_vm7, %v249_v57, %v244_v41  ;;  %v651_v53 = vmul.f32 0.00390625, %v605_v55 }
  0xda   :  { %v292_v40 = vsel %vm291_vm8, %v290_v46, %v251_v22  ;;  %v696_v63 = vrot.slane %v652_v10, %v1790_v17 }
  0xdb   :  { %1257 = vmatmul.mubr.msk.f32.vlgmr.msra.gmra.mrb[0].mxu0 %vm293_vm9, %v292_v40  ;;  %v692_v16 = vrot.slane %v651_v53, %v1787_v35  ;;  %v632_v59 = vpop.xlane.xlu1 %631 }
  0xdc   :  { %1287 = vmatprep.mubr.msk.f32.mxu0 %vm1458_vm0, %v2266_v3  ;;  %v660_v60 = vmul.f32 0.00390625, %v632_v59  ;;  %v629_v34 = vpop.xlane.xlu0 %628 }
  0xdd   :  { %v697_v23 = vsel %vm208_vm1, %v696_v63, %v692_v16  ;;  %v659_v48 = vmul.f32 0.00390625, %v629_v34 }
  0xde   :  { %v735_v43 = vrot.slane %v660_v60, %v1790_v17 }
  0xdf   :  { %v731_v49 = vrot.slane %v659_v48, %v1787_v35  ;;  %v635_v7 = vpop.xlane.xlu1 %634 }
  0xe0   :  { %v661_v42 = vmul.f32 0.00390625, %v635_v7  ;;  %v611_v47 = vpop.xlane.xlu0 %610 }
  0xe1   :  { %v736_v56 = vsel %vm208_vm1, %v735_v43, %v731_v49  ;;  %v653_v54 = vmul.f32 0.00390625, %v611_v47 }
  0xe2   :  { %v740_v51 = vrot.slane %v661_v42, %v1793_v58 }
  0xe3   :  { %v701_v57 = vrot.slane %v653_v54, %v1793_v58  ;;  %v638_v41 = vpop.xlane.xlu1 %637 }
  0xe4   :  { %v741_v46 = vsel %vm215_vm2, %v740_v51, %v736_v56  ;;  %v662_v22 = vmul.f32 0.00390625, %v638_v41  ;;  %v614_v40 = vpop.xlane.xlu0 %613 }
  0xe5   :  { %v702_v61 = vsel %vm215_vm2, %v701_v57, %v697_v23  ;;  %v654_v17 = vmul.f32 0.00390625, %v614_v40 }
  0xe6   :  { %v745_v35 = vrot.slane %v662_v22, %v1796_v29 }
  0xe7   :  { %v706_v10 = vrot.slane %v654_v17, %v1796_v29  ;;  %v641_v55 = vpop.xlane.xlu1 %640 }
  0xe8   :  { %v746_v53 = vsel %vm222_vm3, %v745_v35, %v741_v46  ;;  %v663_v63 = vmul.f32 0.00390625, %v641_v55  ;;  %v617_v16 = vpop.xlane.xlu0 %616 }
  0xe9   :  { %v707_v59 = vsel %vm222_vm3, %v706_v10, %v702_v61  ;;  %v655_v58 = vmul.f32 0.00390625, %v617_v16 }
  0xea   :  { %v750_v60 = vrot.slane %v663_v63, %v1799_v28 }
  0xeb   :  { %v711_v34 = vrot.slane %v655_v58, %v1799_v28  ;;  %v644_v48 = vpop.xlane.xlu1 %643  ;;  %v2267_v58 = vmov 0.0|0.0  }
  0xec   :  { %v751_v23 = vsel %vm229_vm4, %v750_v60, %v746_v53  ;;  %v664_v43 = vmul.f32 0.00390625, %v644_v48  ;;  %v620_v49 = vpop.xlane.xlu0 %619  ;;  %v1206_v60 = vld [vmem:[%s2184_s3] ss:$0 sm:$0xff] }
  0xed   :  { %v712_v7 = vsel %vm229_vm4, %v711_v34, %v707_v59  ;;  %v656_v29 = vmul.f32 0.00390625, %v620_v49  ;;  %v592_v34 = vld [vmem:[%s2187_s6 + $0x8] sm:$0xff] }
  0xee   :  { %v755_v42 = vrot.slane %v664_v43, %v1802_v52 }
  0xef   :  { %v716_v47 = vrot.slane %v656_v29, %v1802_v52  ;;  %v647_v56 = vpop.xlane.xlu1 %646  ;;  %v593_v29 = vld [vmem:[%s2187_s6 + $0x10] sm:$0xff] }
  0xf0   :  { %v756_v54 = vsel %vm236_vm5, %v755_v42, %v751_v23  ;;  %v665_v51 = vmul.f32 0.00390625, %v647_v56  ;;  %v623_v57 = vpop.xlane.xlu0 %622  ;;  %v594_v42 = vld [vmem:[%s2187_s6 + $0x18] sm:$0xff]  ;;  %v595_v56 = vld [vmem:[%s2187_s6 + $0x20] sm:$0xff] }
  0xf1   :  { %v717_v41 = vsel %vm236_vm5, %v716_v47, %v712_v7  ;;  %v657_v28 = vmul.f32 0.00390625, %v623_v57  ;;  %v1306_v47 = vpack.c.bf16 %v594_v42, %v593_v29  ;;  %v597_v57 = vld [vmem:[%s2187_s6 + $0x30] sm:$0xff] }
  0xf2   :  { %v760_v46 = vrot.slane %v665_v51, %v1805_v62 }
  0xf3   :  { %v721_v22 = vrot.slane %v657_v28, %v1805_v62  ;;  %v650_v40 = vpop.xlane.xlu1 %649  ;;  %v109_v62 = vld [vmem:[%s2185_s4] sm:$0x3] }
  0xf4   :  { %v761_v61 = vsel %vm243_vm6, %v760_v46, %v756_v54  ;;  %v666_v17 = vmul.f32 0.00390625, %v650_v40  ;;  %v626_v35 = vpop.xlane.xlu0 %625  ;;  %1260 = vmatpush3.msk.msra.mxu1 %vm377_vm10, %v109_v62  ;;  %v596_v54 = vld [vmem:[%s2187_s6 + $0x28] sm:$0xff]  ;;  %v600_v28 = vld [vmem:[%s2189_s8] sm:$0xff] }
  0xf5   :  { %v722_v10 = vsel %vm243_vm6, %v721_v22, %v717_v41  ;;  %v658_v52 = vmul.f32 0.00390625, %v626_v35  ;;  %1302 = vmatprep.subr.bf16.mxu1 %v2267_v58  ;;  %v1309_v51 = vpack.c.bf16 %v596_v54, %v595_v56  ;;  %v601_v46 = vld [vmem:[%s2189_s8 + $0x8] sm:$0xff]  ;;  %v1208_v40 = vld [vmem:[%s2186_s5] ss:$0 sm:$0xff]  ;;  %s1460_s8 = smov [#allocation8]  }
  0xf6   :  { %v765_v55 = vrot.slane %v666_v17, %v1820_v50  ;;  %v1315_v22 = vpack.c.bf16 %v601_v46, %v600_v28 }
  0xf7   :  { %v726_v53 = vrot.slane %v658_v52, %v1820_v50  ;;  %v591_v50 = vld [vmem:[%s2187_s6] sm:$0xff] }
  0xf8   :  { %v766_v63 = vsel %vm250_vm7, %v765_v55, %v761_v61  ;;  %v1303_v49 = vpack.c.bf16 %v592_v34, %v591_v50  ;;  %1316 = vmatpush3.bf16.msra.mxu0 %v1315_v22  ;;  %v1212_v52 = vld [vmem:[%s2188_s7] ss:$0 sm:$0xff]  ;;  %v494_v34 = vsub.s32 1, %v1784_v11 }
  0xf9   :  { %v727_v16 = vsel %vm250_vm7, %v726_v53, %v722_v10 }
  0xfa   :  { %v767_v59 = vsel %vm291_vm8, %v766_v63, %v727_v16 }
 0x1ae   :  { %v362_v48 = vpop.f32.mrb[0].mxu0 }
 0x1af   :  { %v363_v23 = vadd.f32 %v1206_v60, %v362_v48  ;;  %v1258_v43 = vpop.f32.mrb[1].mxu0 }
 0x1b1   :  { %v366_v7 = vmax.f32 %v363_v23, 0.0 }
 0x1b3   :  { %1262 = vmatmul.mubr.msk.f32.vlgmr.msra.gmra.mrb[0].mxu1 %vm373_vm11, %v366_v7 }
 0x1b4   :  { %1304 = vmatpush3.bf16.msra.mxu1 %v1303_v49  ;;  %1280 = vmatprep.mubr.msk.f32.mxu1 %vm1458_vm0, %v2266_v3  ;;  %v598_v3 = vld [vmem:[%s2187_s6 + $0x38] sm:$0xff] }
 0x1b5   :  { %1305 = vmatprep.subr.bf16.mxu1 %v2267_v58  ;;  %v1312_v41 = vpack.c.bf16 %v598_v3, %v597_v57 }
 0x1b8   :  { %1307 = vmatpush3.bf16.msra.mxu1 %v1306_v47 }
 0x1b9   :  { %1308 = vmatprep.subr.bf16.mxu1 %v2267_v58 }
 0x1bc   :  { %1310 = vmatpush3.bf16.msra.mxu1 %v1309_v51 }
 0x1bd   :  { %1311 = vmatprep.subr.bf16.mxu1 %v2267_v58  ;;  %v459_v58 = vsub.s32 0, %v1784_v11 }
 0x1c0   :  { %1313 = vmatpush3.bf16.msra.mxu1 %v1312_v41 }
 0x1c3   :  { %1281 = vmatmul.mubr.msk.f32.vlgmr.msra.gmra.mrb[2].mxu1 %vm293_vm9, %v767_v59 }
 0x286   :  { %v447_v61 = vpop.f32.mrb[0].mxu1 }
 0x287   :  { %v448_v17 = vadd.f32 %v1208_v40, %v447_v61  ;;  %v1263_v35 = vpop.f32.mrb[1].mxu1 }
 0x289   :  { %v1211_v10 = vmul.f32 -1.442695, %v448_v17 }
 0x28b   :  { %1327 = vpow2.f32 %v1211_v10  ;;  %v2269_v10 = vld [vmem:[#allocation16_spill] sm:$0xff] }
 0x295   :  { %v1328_v55 = vpop.eup %1327 }
 0x296   :  { %v454_v53 = vadd.f32 1.0, %v1328_v55  ;;  %v836_v63 = vpop.f32.mrb[2].mxu1 }
 0x297   :  { %v837_v16 = vadd.f32 %v1212_v52, %v836_v63  ;;  %v1282_v59 = vpop.f32.mrb[3].mxu1 }
 0x298   :  { %1329 = vrcp.f32 %v454_v53 }
 0x299   :  { %v840_v62 = vmax.f32 %v837_v16, 0.0 }
 0x29b   :  { %1288 = vmatmul.mubr.msk.f32.vlgmr.msra.gmra.mrb[2].mxu0 %vm847_vm12, %v840_v62 }
 0x2a2   :  { %v1330_v60 = vpop.eup %1329 }
 0x2a3   :  { %v460_v50 = vrot.slane %v1330_v60, %v459_v58  ;;  %v495_v48 = vrot.slane %v1330_v60, %v494_v34 }
 0x2a5   :  { %466 = vbcast.lane.b32.xlu1 %v460_v50, 264  ;;  %462 = vbcast.lane.b32.xlu0 %v460_v50, 256 }
 0x2a9   :  { %470 = vbcast.lane.b32.xlu1 %v460_v50, 272  ;;  %478 = vbcast.lane.b32.xlu0 %v460_v50, 288 }
 0x2ad   :  { %474 = vbcast.lane.b32.xlu1 %v460_v50, 280  ;;  %486 = vbcast.lane.b32.xlu0 %v460_v50, 304 }
 0x2b1   :  { %482 = vbcast.lane.b32.xlu1 %v460_v50, 296  ;;  %497 = vbcast.lane.b32.xlu0 %v495_v48, 256 }
 0x2b5   :  { %490 = vbcast.lane.b32.xlu1 %v460_v50, 312  ;;  %505 = vbcast.lane.b32.xlu0 %v495_v48, 272 }
 0x2b9   :  { %501 = vbcast.lane.b32.xlu1 %v495_v48, 264  ;;  %513 = vbcast.lane.b32.xlu0 %v495_v48, 288 }
 0x2bd   :  { %509 = vbcast.lane.b32.xlu1 %v495_v48, 280  ;;  %521 = vbcast.lane.b32.xlu0 %v495_v48, 304 }
 0x2c1   :  { %517 = vbcast.lane.b32.xlu1 %v495_v48, 296 }
 0x2c5   :  { %525 = vbcast.lane.b32.xlu1 %v495_v48, 312 }
 0x317   :  { %v467_v23 = vpop.permute.xlu1 %466  ;;  %v463_v43 = vpop.permute.xlu0 %462 }
 0x318   :  { %v1931_v49 = vmul.f32 %v467_v23, %v1574_v8  ;;  %v1934_v7 = vmul.f32 %v467_v23, %v1576_v9  ;;  %v1937_v29 = vmul.f32 %v463_v43, %v1562_v2  ;;  %v1940_v42 = vmul.f32 %v463_v43, %v1566_v4 }
 0x31a   :  { %1031 = vst [vmem:[#allocation8 + $0x10] sm:$0xff] %v1931_v49  ;;  %1032 = vst [vmem:[#allocation8 + $0x18] sm:$0xff] %v1934_v7 }
 0x31b   :  { %1029 = vst [vmem:[#allocation8] sm:$0xff] %v1937_v29  ;;  %1030 = vst [vmem:[#allocation8 + $0x8] sm:$0xff] %v1940_v42  ;;  %v471_v47 = vpop.permute.xlu1 %470  ;;  %v479_v8 = vpop.permute.xlu0 %478 }
 0x31c   :  { %v1947_v56 = vmul.f32 %v471_v47, %v1586_v14  ;;  %v1950_v9 = vmul.f32 %v471_v47, %v1588_v15  ;;  %v1953_v2 = vmul.f32 %v479_v8, %v1610_v26  ;;  %v1956_v4 = vmul.f32 %v479_v8, %v1612_v27 }
 0x31e   :  { %1033 = vst [vmem:[#allocation8 + $0x20] sm:$0xff] %v1947_v56  ;;  %1034 = vst [vmem:[#allocation8 + $0x28] sm:$0xff] %v1950_v9 }
 0x31f   :  { %1037 = vst [vmem:[#allocation8 + $0x40] sm:$0xff] %v1953_v2  ;;  %1038 = vst [vmem:[#allocation8 + $0x48] sm:$0xff] %v1956_v4  ;;  %v475_v54 = vpop.permute.xlu1 %474  ;;  %v487_v14 = vpop.permute.xlu0 %486 }
 0x320   :  { %v1963_v51 = vmul.f32 %v475_v54, %v1598_v20  ;;  %v1966_v15 = vmul.f32 %v475_v54, %v1600_v21  ;;  %v1969_v26 = vmul.f32 %v487_v14, %v1634_v38  ;;  %v1972_v27 = vmul.f32 %v487_v14, %v1636_v39 }
 0x322   :  { %1035 = vst [vmem:[#allocation8 + $0x30] sm:$0xff] %v1963_v51  ;;  %1036 = vst [vmem:[#allocation8 + $0x38] sm:$0xff] %v1966_v15 }
 0x323   :  { %1041 = vst [vmem:[#allocation8 + $0x60] sm:$0xff] %v1969_v26  ;;  %1042 = vst [vmem:[#allocation8 + $0x68] sm:$0xff] %v1972_v27  ;;  %v483_v57 = vpop.permute.xlu1 %482  ;;  %v498_v20 = vpop.permute.xlu0 %497 }
 0x324   :  { %v1979_v3 = vmul.f32 %v483_v57, %v1622_v32  ;;  %v1982_v21 = vmul.f32 %v483_v57, %v1624_v33  ;;  %v1985_v38 = vmul.f32 %v498_v20, %v1558_v0  ;;  %v1988_v39 = vmul.f32 %v498_v20, %v1560_v1 }
 0x326   :  { %1039 = vst [vmem:[#allocation8 + $0x50] sm:$0xff] %v1979_v3  ;;  %1040 = vst [vmem:[#allocation8 + $0x58] sm:$0xff] %v1982_v21 }
 0x327   :  { %1045 = vst [vmem:[#allocation8 + $0x80] sm:$0xff] %v1985_v38  ;;  %1046 = vst [vmem:[#allocation8 + $0x88] sm:$0xff] %v1988_v39  ;;  %v491_v41 = vpop.permute.xlu1 %490  ;;  %v506_v32 = vpop.permute.xlu0 %505 }
 0x328   :  { %v1995_v28 = vmul.f32 %v491_v41, %v1646_v44  ;;  %v1998_v33 = vmul.f32 %v491_v41, %v1648_v45  ;;  %v2001_v0 = vmul.f32 %v506_v32, %v1582_v12  ;;  %v2004_v1 = vmul.f32 %v506_v32, %v1584_v13 }
 0x32a   :  { %1043 = vst [vmem:[#allocation8 + $0x70] sm:$0xff] %v1995_v28  ;;  %1044 = vst [vmem:[#allocation8 + $0x78] sm:$0xff] %v1998_v33 }
 0x32b   :  { %1049 = vst [vmem:[#allocation8 + $0xa0] sm:$0xff] %v2001_v0  ;;  %1050 = vst [vmem:[#allocation8 + $0xa8] sm:$0xff] %v2004_v1  ;;  %v502_v46 = vpop.permute.xlu1 %501  ;;  %v514_v44 = vpop.permute.xlu0 %513 }
 0x32c   :  { %v2011_v22 = vmul.f32 %v502_v46, %v1568_v5  ;;  %v2014_v45 = vmul.f32 %v502_v46, %v1570_v6  ;;  %v2017_v12 = vmul.f32 %v514_v44, %v1606_v24  ;;  %v2020_v13 = vmul.f32 %v514_v44, %v1608_v25 }
 0x32e   :  { %1047 = vst [vmem:[#allocation8 + $0x90] sm:$0xff] %v2011_v22  ;;  %1048 = vst [vmem:[#allocation8 + $0x98] sm:$0xff] %v2014_v45 }
 0x32f   :  { %1053 = vst [vmem:[#allocation8 + $0xc0] sm:$0xff] %v2017_v12  ;;  %1054 = vst [vmem:[#allocation8 + $0xc8] sm:$0xff] %v2020_v13  ;;  %v510_v40 = vpop.permute.xlu1 %509  ;;  %v522_v5 = vpop.permute.xlu0 %521 }
 0x330   :  { %v2027_v61 = vmul.f32 %v510_v40, %v1594_v18  ;;  %v2030_v6 = vmul.f32 %v510_v40, %v1596_v19  ;;  %v2033_v24 = vmul.f32 %v522_v5, %v1630_v36  ;;  %v2036_v25 = vmul.f32 %v522_v5, %v1632_v37  ;;  %v2268_v37 = vld [vmem:[#allocation15_spill] sm:$0xff] }
 0x332   :  { %1051 = vst [vmem:[#allocation8 + $0xb0] sm:$0xff] %v2027_v61  ;;  %1052 = vst [vmem:[#allocation8 + $0xb8] sm:$0xff] %v2030_v6 }
 0x333   :  { %1057 = vst [vmem:[#allocation8 + $0xe0] sm:$0xff] %v2033_v24  ;;  %1058 = vst [vmem:[#allocation8 + $0xe8] sm:$0xff] %v2036_v25  ;;  %v518_v17 = vpop.permute.xlu1 %517 }
 0x334   :  { %v2043_v18 = vmul.f32 %v518_v17, %v1618_v30  ;;  %v2046_v19 = vmul.f32 %v518_v17, %v1620_v31  ;;  %v1214_v30 = vld [vmem:[%s2190_s9] ss:$0 sm:$0xff]  ;;  %s1174_s9 = sshll.u32 %s1460_s8, 4  ;;  %s1175_s9 = int_to_ptr.vmem [resolvable:$true] %s1174_s9 }
 0x335   :  { %s1379_s30 = scalar_lea.vmem %s1175_s9, 4096  ;;  %p1384_p3 = scmp.lt.s32.totalorder %s1175_s9, %s1175_s9 }
 0x336   :  { %1055 = vst [vmem:[#allocation8 + $0xd0] sm:$0xff] %v2043_v18  ;;  %1056 = vst [vmem:[#allocation8 + $0xd8] sm:$0xff] %v2046_v19  ;;  %p1380_p2 = scmp.ne.s32.totalorder %s1175_s9, %s1379_s30  ;;  %p1385_p4 = scmp.lt.s32.totalorder %s1379_s30, %s1379_s30 }
 0x337   :  { %v526_v36 = vpop.permute.xlu1 %525 }
 0x338   :  { %v2051_v35 = vmul.f32 %v526_v36, %v2268_v37  ;;  %v2054_v52 = vmul.f32 %v526_v36, %v2269_v10  ;;  %p1386_p5 = por %p1385_p4, %p1384_p3 }
 0x33a   :  { %1059 = vst [vmem:[#allocation8 + $0xf0] sm:$0xff] %v2051_v35  ;;  %1060 = vst [vmem:[#allocation8 + $0xf8] sm:$0xff] %v2054_v52  ;;  %p1387_p6 = pnand %p1386_p5, %p1380_p2 }
 0x36e   :  { %v917_v31 = vpop.f32.mrb[2].mxu0 }
 0x36f   :  { %v918_v55 = vadd.f32 %v1214_v30, %v917_v31  ;;  %v1289_v53 = vpop.f32.mrb[3].mxu0 }
 0x371   :  { %v1216_v63 = vmul.f32 -1.442695, %v918_v55 }
 0x373   :  { %1331 = vpow2.f32 %v1216_v63 }
 0x37d   :  { %v1332_v16 = vpop.eup %1331 }
 0x37e   :  { %v924_v59 = vadd.f32 1.0, %v1332_v16 }
 0x380   :  { %1333 = vrcp.f32 %v924_v59 }
 0x38a   :  { %v1334_v62 = vpop.eup %1333 }
 0x38b   :  { %v930_v60 = vrot.slane %v1334_v62, %v459_v58  ;;  %v965_v50 = vrot.slane %v1334_v62, %v494_v34 }
 0x38d   :  { %936 = vbcast.lane.b32.xlu1 %v930_v60, 264  ;;  %932 = vbcast.lane.b32.xlu0 %v930_v60, 256 }
 0x391   :  { %944 = vbcast.lane.b32.xlu1 %v930_v60, 280  ;;  %940 = vbcast.lane.b32.xlu0 %v930_v60, 272 }
 0x395   :  { %952 = vbcast.lane.b32.xlu1 %v930_v60, 296  ;;  %948 = vbcast.lane.b32.xlu0 %v930_v60, 288 }
 0x399   :  { %960 = vbcast.lane.b32.xlu1 %v930_v60, 312  ;;  %956 = vbcast.lane.b32.xlu0 %v930_v60, 304 }
 0x39d   :  { %971 = vbcast.lane.b32.xlu1 %v965_v50, 264  ;;  %967 = vbcast.lane.b32.xlu0 %v965_v50, 256 }
 0x39e   :  { %1390 = shalt.err (!%p1387_p6)
}
 0x39f   :  { %s1391_s16 = scalar_lea.hbm %s2192_s11, 4096 }
 0x3a0   :  { %p1392_p7 = scmp.ne.s32.totalorder %s2192_s11, %s1391_s16  ;;  %p1395_p8 = scmp.lt.u32.totalorder %s1391_s16, %s2192_s11 }
 0x3a2   :  { %p1397_p9 = pnand %p1395_p8, %p1392_p7 }
 0x3a4   :  { %1400 = shalt.err (!%p1397_p9)
}
 0x3a5   :  { %1180 = dma.vmem_to_hbm [thread:$0]  %s1175_s9, 4096, %s2192_s11, [#allocation9], %s1454_s13, %s1454_s13, %s1455_s14   ;;  %979 = vbcast.lane.b32.xlu1 %v965_v50, 280  ;;  %975 = vbcast.lane.b32.xlu0 %v965_v50, 272  ;;  %v2270_v34 = vld [vmem:[#allocation17_spill] sm:$0xff]  ;;  %v2271_v23 = vld [vmem:[#allocation18_spill] sm:$0xff] }
 0x3a6   :  { %v2272_v47 = vld [vmem:[#allocation19_spill] sm:$0xff]  ;;  %v2273_v54 = vld [vmem:[#allocation20_spill] sm:$0xff]  ;;  %s1461_s11 = smov [#allocation10]   ;;  %s1462_s24 = smov [#allocation7]  }
 0x3a7   :  { %v2274_v40 = vld [vmem:[#allocation31_spill] sm:$0xff]  ;;  %v2275_v17 = vld [vmem:[#allocation32_spill] sm:$0xff]  ;;  %s1186_s23 = sshll.u32 %s1461_s11, 4  ;;  %s1162_s25 = sshll.u32 %s1462_s24, 4  ;;  %s1187_s23 = int_to_ptr.vmem [resolvable:$true] %s1186_s23  ;;  %s2144_s25 = int_to_ptr.vmem [resolvable:$true] %s1162_s25 }
 0x3a8   :  { %v2276_v37 = vld [vmem:[#allocation27_spill] sm:$0xff]  ;;  %v2277_v10 = vld [vmem:[#allocation28_spill] sm:$0xff]  ;;  %s1401_s26 = scalar_lea.vmem %s1187_s23, 4096  ;;  %p1406_p11 = scmp.lt.s32.totalorder %s1187_s23, %s1187_s23 }
 0x3a9   :  { %987 = vbcast.lane.b32.xlu1 %v965_v50, 296  ;;  %983 = vbcast.lane.b32.xlu0 %v965_v50, 288  ;;  %v2278_v63 = vld [vmem:[#allocation39_spill] sm:$0xff]  ;;  %v2279_v59 = vld [vmem:[#allocation40_spill] sm:$0xff]  ;;  %p1402_p10 = scmp.ne.s32.totalorder %s1187_s23, %s1401_s26  ;;  %p1407_p12 = scmp.lt.s32.totalorder %s1401_s26, %s1401_s26 }
 0x3aa   :  { %v2280_v60 = vld [vmem:[#allocation35_spill] sm:$0xff] }
 0x3ab   :  { %p1408_p13 = por %p1407_p12, %p1406_p11 }
 0x3ad   :  { %995 = vbcast.lane.b32.xlu1 %v965_v50, 312  ;;  %991 = vbcast.lane.b32.xlu0 %v965_v50, 304  ;;  %v2281_v50 = vld [vmem:[#allocation36_spill] sm:$0xff]  ;;  %p1409_p0 = pnand %p1408_p13, %p1402_p10 }
 0x3ff   :  { %v937_v11 = vpop.permute.xlu1 %936  ;;  %v933_v58 = vpop.permute.xlu0 %932 }
 0x400   :  { %v999_v48 = vmul.f32 %v937_v11, %v2270_v34  ;;  %v1000_v43 = vmul.f32 %v937_v11, %v2271_v23  ;;  %v997_v8 = vmul.f32 %v933_v58, %v2272_v47  ;;  %v998_v14 = vmul.f32 %v933_v58, %v2273_v54  ;;  %v2282_v23 = vld [vmem:[#allocation47_spill] sm:$0xff]  ;;  %v2283_v47 = vld [vmem:[#allocation48_spill] sm:$0xff] }
 0x401   :  { %v2284_v54 = vld [vmem:[#allocation43_spill] sm:$0xff] }
 0x402   :  { %1063 = vst [vmem:[#allocation10 + $0x10] sm:$0xff] %v999_v48  ;;  %1064 = vst [vmem:[#allocation10 + $0x18] sm:$0xff] %v1000_v43  ;;  %v1095_v57 = vadd.f32 %v999_v48, %v1931_v49  ;;  %v1096_v20 = vadd.f32 %v1000_v43, %v1934_v7  ;;  %v1093_v41 = vadd.f32 %v997_v8, %v1937_v29 }
 0x403   :  { %1061 = vst [vmem:[#allocation10] sm:$0xff] %v997_v8  ;;  %1062 = vst [vmem:[#allocation10 + $0x8] sm:$0xff] %v998_v14  ;;  %v1094_v32 = vadd.f32 %v998_v14, %v1940_v42  ;;  %v945_v46 = vpop.permute.xlu1 %944  ;;  %v941_v44 = vpop.permute.xlu0 %940  ;;  %v2285_v14 = vld [vmem:[#allocation44_spill] sm:$0xff] }
 0x404   :  { %1127 = vst [vmem:[#allocation7 + $0x10] sm:$0xff] %v1095_v57  ;;  %1128 = vst [vmem:[#allocation7 + $0x18] sm:$0xff] %v1096_v20  ;;  %v1003_v5 = vmul.f32 %v945_v46, %v2274_v40  ;;  %v1004_v36 = vmul.f32 %v945_v46, %v2275_v17  ;;  %v1001_v49 = vmul.f32 %v941_v44, %v2276_v37  ;;  %v2286_v46 = vld [vmem:[#allocation21_spill] sm:$0xff]  ;;  %v2287_v40 = vld [vmem:[#allocation22_spill] sm:$0xff] }
 0x405   :  { %1125 = vst [vmem:[#allocation7] sm:$0xff] %v1093_v41  ;;  %1126 = vst [vmem:[#allocation7 + $0x8] sm:$0xff] %v1094_v32  ;;  %v1002_v7 = vmul.f32 %v941_v44, %v2277_v10  ;;  %v2288_v17 = vld [vmem:[#allocation23_spill] sm:$0xff] }
 0x406   :  { %1067 = vst [vmem:[#allocation10 + $0x30] sm:$0xff] %v1003_v5  ;;  %1068 = vst [vmem:[#allocation10 + $0x38] sm:$0xff] %v1004_v36  ;;  %v1099_v29 = vadd.f32 %v1003_v5, %v1963_v51  ;;  %v1100_v42 = vadd.f32 %v1004_v36, %v1966_v15  ;;  %v1097_v30 = vadd.f32 %v1001_v49, %v1947_v56  ;;  %v2289_v36 = vld [vmem:[#allocation24_spill] sm:$0xff] }
 0x407   :  { %1065 = vst [vmem:[#allocation10 + $0x20] sm:$0xff] %v1001_v49  ;;  %1066 = vst [vmem:[#allocation10 + $0x28] sm:$0xff] %v1002_v7  ;;  %v1098_v31 = vadd.f32 %v1002_v7, %v1950_v9  ;;  %v953_v55 = vpop.permute.xlu1 %952  ;;  %v949_v53 = vpop.permute.xlu0 %948 }
 0x408   :  { %1131 = vst [vmem:[#allocation7 + $0x30] sm:$0xff] %v1099_v29  ;;  %1132 = vst [vmem:[#allocation7 + $0x38] sm:$0xff] %v1100_v42  ;;  %v1007_v16 = vmul.f32 %v953_v55, %v2278_v63  ;;  %v1008_v62 = vmul.f32 %v953_v55, %v2279_v59  ;;  %v1005_v51 = vmul.f32 %v949_v53, %v2280_v60  ;;  %v2290_v29 = vld [vmem:[#allocation29_spill] sm:$0xff] }
 0x409   :  { %1129 = vst [vmem:[#allocation7 + $0x20] sm:$0xff] %v1097_v30  ;;  %1130 = vst [vmem:[#allocation7 + $0x28] sm:$0xff] %v1098_v31  ;;  %v1006_v15 = vmul.f32 %v949_v53, %v2281_v50  ;;  %v2291_v30 = vld [vmem:[#allocation30_spill] sm:$0xff]  ;;  %v2292_v55 = vld [vmem:[#allocation25_spill] sm:$0xff] }
 0x40a   :  { %1071 = vst [vmem:[#allocation10 + $0x50] sm:$0xff] %v1007_v16  ;;  %1072 = vst [vmem:[#allocation10 + $0x58] sm:$0xff] %v1008_v62  ;;  %v1103_v56 = vadd.f32 %v1007_v16, %v1979_v3  ;;  %v1104_v9 = vadd.f32 %v1008_v62, %v1982_v21  ;;  %v1101_v11 = vadd.f32 %v1005_v51, %v1953_v2  ;;  %v2293_v53 = vld [vmem:[#allocation26_spill] sm:$0xff]  ;;  %v2294_v60 = vld [vmem:[#allocation37_spill] sm:$0xff] }
 0x40b   :  { %1069 = vst [vmem:[#allocation10 + $0x40] sm:$0xff] %v1005_v51  ;;  %1070 = vst [vmem:[#allocation10 + $0x48] sm:$0xff] %v1006_v15  ;;  %v1102_v58 = vadd.f32 %v1006_v15, %v1956_v4  ;;  %v961_v34 = vpop.permute.xlu1 %960  ;;  %v957_v48 = vpop.permute.xlu0 %956  ;;  %v2295_v50 = vld [vmem:[#allocation38_spill] sm:$0xff] }
 0x40c   :  { %1135 = vst [vmem:[#allocation7 + $0x50] sm:$0xff] %v1103_v56  ;;  %1136 = vst [vmem:[#allocation7 + $0x58] sm:$0xff] %v1104_v9  ;;  %v1011_v43 = vmul.f32 %v961_v34, %v2282_v23  ;;  %v1012_v8 = vmul.f32 %v961_v34, %v2283_v47  ;;  %v1009_v3 = vmul.f32 %v957_v48, %v2284_v54  ;;  %v2296_v56 = vld [vmem:[#allocation33_spill] sm:$0xff]  ;;  %v2297_v9 = vld [vmem:[#allocation34_spill] sm:$0xff] }
 0x40d   :  { %1133 = vst [vmem:[#allocation7 + $0x40] sm:$0xff] %v1101_v11  ;;  %1134 = vst [vmem:[#allocation7 + $0x48] sm:$0xff] %v1102_v58  ;;  %v1010_v21 = vmul.f32 %v957_v48, %v2285_v14  ;;  %v2298_v23 = vld [vmem:[#allocation45_spill] sm:$0xff]  ;;  %v2299_v47 = vld [vmem:[#allocation46_spill] sm:$0xff] }
 0x40e   :  { %1075 = vst [vmem:[#allocation10 + $0x70] sm:$0xff] %v1011_v43  ;;  %1076 = vst [vmem:[#allocation10 + $0x78] sm:$0xff] %v1012_v8  ;;  %v1107_v2 = vadd.f32 %v1011_v43, %v1995_v28  ;;  %v1108_v4 = vadd.f32 %v1012_v8, %v1998_v33  ;;  %v1105_v57 = vadd.f32 %v1009_v3, %v1969_v26  ;;  %v2300_v8 = vld [vmem:[#allocation41_spill] sm:$0xff]  ;;  %v2301_v54 = vld [vmem:[#allocation42_spill] sm:$0xff] }
 0x40f   :  { %1073 = vst [vmem:[#allocation10 + $0x60] sm:$0xff] %v1009_v3  ;;  %1074 = vst [vmem:[#allocation10 + $0x68] sm:$0xff] %v1010_v21  ;;  %v1106_v20 = vadd.f32 %v1010_v21, %v1972_v27  ;;  %v972_v41 = vpop.permute.xlu1 %971  ;;  %v968_v32 = vpop.permute.xlu0 %967 }
 0x410   :  { %1139 = vst [vmem:[#allocation7 + $0x70] sm:$0xff] %v1107_v2  ;;  %1140 = vst [vmem:[#allocation7 + $0x78] sm:$0xff] %v1108_v4  ;;  %v1015_v44 = vmul.f32 %v972_v41, %v2286_v46  ;;  %v1016_v5 = vmul.f32 %v972_v41, %v2287_v40  ;;  %v1013_v28 = vmul.f32 %v968_v32, %v2288_v17 }
 0x411   :  { %1137 = vst [vmem:[#allocation7 + $0x60] sm:$0xff] %v1105_v57  ;;  %1138 = vst [vmem:[#allocation7 + $0x68] sm:$0xff] %v1106_v20  ;;  %v1014_v33 = vmul.f32 %v968_v32, %v2289_v36 }
 0x412   :  { %1079 = vst [vmem:[#allocation10 + $0x90] sm:$0xff] %v1015_v44  ;;  %1080 = vst [vmem:[#allocation10 + $0x98] sm:$0xff] %v1016_v5  ;;  %v1111_v26 = vadd.f32 %v1015_v44, %v2011_v22  ;;  %v1112_v27 = vadd.f32 %v1016_v5, %v2014_v45  ;;  %v1109_v37 = vadd.f32 %v1013_v28, %v1985_v38 }
 0x413   :  { %1077 = vst [vmem:[#allocation10 + $0x80] sm:$0xff] %v1013_v28  ;;  %1078 = vst [vmem:[#allocation10 + $0x88] sm:$0xff] %v1014_v33  ;;  %v1110_v49 = vadd.f32 %v1014_v33, %v1988_v39 }
 0x414   :  { %1143 = vst [vmem:[#allocation7 + $0x90] sm:$0xff] %v1111_v26  ;;  %1144 = vst [vmem:[#allocation7 + $0x98] sm:$0xff] %v1112_v27 }
 0x415   :  { %1141 = vst [vmem:[#allocation7 + $0x80] sm:$0xff] %v1109_v37  ;;  %1142 = vst [vmem:[#allocation7 + $0x88] sm:$0xff] %v1110_v49 }
 0x417   :  { %v980_v10 = vpop.permute.xlu1 %979  ;;  %v976_v7 = vpop.permute.xlu0 %975 }
 0x418   :  { %v1019_v42 = vmul.f32 %v980_v10, %v2290_v29  ;;  %v1020_v31 = vmul.f32 %v980_v10, %v2291_v30  ;;  %v1017_v22 = vmul.f32 %v976_v7, %v2292_v55  ;;  %v1018_v45 = vmul.f32 %v976_v7, %v2293_v53 }
 0x41a   :  { %1083 = vst [vmem:[#allocation10 + $0xb0] sm:$0xff] %v1019_v42  ;;  %1084 = vst [vmem:[#allocation10 + $0xb8] sm:$0xff] %v1020_v31  ;;  %v1115_v38 = vadd.f32 %v1019_v42, %v2027_v61  ;;  %v1116_v39 = vadd.f32 %v1020_v31, %v2030_v6  ;;  %v1113_v63 = vadd.f32 %v1017_v22, %v2001_v0 }
 0x41b   :  { %1081 = vst [vmem:[#allocation10 + $0xa0] sm:$0xff] %v1017_v22  ;;  %1082 = vst [vmem:[#allocation10 + $0xa8] sm:$0xff] %v1018_v45  ;;  %v1114_v16 = vadd.f32 %v1018_v45, %v2004_v1  ;;  %v988_v59 = vpop.permute.xlu1 %987  ;;  %v984_v62 = vpop.permute.xlu0 %983 }
 0x41c   :  { %1147 = vst [vmem:[#allocation7 + $0xb0] sm:$0xff] %v1115_v38  ;;  %1148 = vst [vmem:[#allocation7 + $0xb8] sm:$0xff] %v1116_v39  ;;  %v1023_v51 = vmul.f32 %v988_v59, %v2294_v60  ;;  %v1024_v15 = vmul.f32 %v988_v59, %v2295_v50  ;;  %v1021_v61 = vmul.f32 %v984_v62, %v2296_v56 }
 0x41d   :  { %1145 = vst [vmem:[#allocation7 + $0xa0] sm:$0xff] %v1113_v63  ;;  %1146 = vst [vmem:[#allocation7 + $0xa8] sm:$0xff] %v1114_v16  ;;  %v1022_v6 = vmul.f32 %v984_v62, %v2297_v9 }
 0x41e   :  { %1087 = vst [vmem:[#allocation10 + $0xd0] sm:$0xff] %v1023_v51  ;;  %1088 = vst [vmem:[#allocation10 + $0xd8] sm:$0xff] %v1024_v15  ;;  %v1119_v0 = vadd.f32 %v1023_v51, %v2043_v18  ;;  %v1120_v1 = vadd.f32 %v1024_v15, %v2046_v19  ;;  %v1117_v11 = vadd.f32 %v1021_v61, %v2017_v12 }
 0x41f   :  { %1085 = vst [vmem:[#allocation10 + $0xc0] sm:$0xff] %v1021_v61  ;;  %1086 = vst [vmem:[#allocation10 + $0xc8] sm:$0xff] %v1022_v6  ;;  %v1118_v58 = vadd.f32 %v1022_v6, %v2020_v13  ;;  %v996_v34 = vpop.permute.xlu1 %995  ;;  %v992_v48 = vpop.permute.xlu0 %991 }
 0x420   :  { %1151 = vst [vmem:[#allocation7 + $0xd0] sm:$0xff] %v1119_v0  ;;  %1152 = vst [vmem:[#allocation7 + $0xd8] sm:$0xff] %v1120_v1  ;;  %v1027_v43 = vmul.f32 %v996_v34, %v2298_v23  ;;  %v1028_v18 = vmul.f32 %v996_v34, %v2299_v47  ;;  %v1025_v19 = vmul.f32 %v992_v48, %v2300_v8 }
 0x421   :  { %1149 = vst [vmem:[#allocation7 + $0xc0] sm:$0xff] %v1117_v11  ;;  %1150 = vst [vmem:[#allocation7 + $0xc8] sm:$0xff] %v1118_v58  ;;  %v1026_v3 = vmul.f32 %v992_v48, %v2301_v54 }
 0x422   :  { %1091 = vst [vmem:[#allocation10 + $0xf0] sm:$0xff] %v1027_v43  ;;  %1092 = vst [vmem:[#allocation10 + $0xf8] sm:$0xff] %v1028_v18  ;;  %v1123_v12 = vadd.f32 %v1027_v43, %v2051_v35  ;;  %v1124_v13 = vadd.f32 %v1028_v18, %v2054_v52  ;;  %v1121_v14 = vadd.f32 %v1025_v19, %v2033_v24 }
 0x423   :  { %1089 = vst [vmem:[#allocation10 + $0xe0] sm:$0xff] %v1025_v19  ;;  %1090 = vst [vmem:[#allocation10 + $0xe8] sm:$0xff] %v1026_v3  ;;  %v1122_v21 = vadd.f32 %v1026_v3, %v2036_v25 }
 0x424   :  { %1412 = shalt.err (!%p1409_p0)
}
 0x425   :  { %s1413_s0 = scalar_lea.hbm %s2193_s12, 4096 }
 0x426   :  { %p1414_p1 = scmp.ne.s32.totalorder %s2193_s12, %s1413_s0  ;;  %p1417_p2 = scmp.lt.u32.totalorder %s1413_s0, %s2193_s12 }
 0x428   :  { %p1419_p3 = pnand %p1417_p2, %p1414_p1 }
 0x42a   :  { %1422 = shalt.err (!%p1419_p3)
}
 0x42b   :  { %1192 = dma.vmem_to_hbm [thread:$0]  %s1187_s23, 4096, %s2193_s12, [#allocation9], %s1454_s13, %s1454_s13, %s1455_s14   ;;  %1155 = vst [vmem:[#allocation7 + $0xf0] sm:$0xff] %v1123_v12  ;;  %1156 = vst [vmem:[#allocation7 + $0xf8] sm:$0xff] %v1124_v13 }
 0x42c   :  { %1153 = vst [vmem:[#allocation7 + $0xe0] sm:$0xff] %v1121_v14  ;;  %1154 = vst [vmem:[#allocation7 + $0xe8] sm:$0xff] %v1122_v21  ;;  %s1423_s7 = scalar_lea.vmem %s2144_s25, 4096  ;;  %p1428_p5 = scmp.lt.s32.totalorder %s2144_s25, %s2144_s25 }
 0x42d   :  { %p1424_p4 = scmp.ne.s32.totalorder %s2144_s25, %s1423_s7  ;;  %p1429_p6 = scmp.lt.s32.totalorder %s1423_s7, %s1423_s7 }
 0x42f   :  { %p1430_p7 = por %p1429_p6, %p1428_p5 }
 0x431   :  { %p1431_p8 = pnand %p1430_p7, %p1424_p4 }
 0x433   :  { %1434 = shalt.err (!%p1431_p8)
}
 0x434   :  { %s1435_s30 = scalar_lea.hbm %s2191_s10, 4096 }
 0x435   :  { %p1436_p9 = scmp.ne.s32.totalorder %s2191_s10, %s1435_s30  ;;  %p1439_p10 = scmp.lt.u32.totalorder %s1435_s30, %s2191_s10 }
 0x437   :  { %p1441_p11 = pnand %p1439_p10, %p1436_p9 }
 0x439   :  { %1444 = shalt.err (!%p1441_p11)
}
 0x43a   :  { %1168 = dma.vmem_to_hbm [thread:$0]  %s2144_s25, 4096, %s2191_s10, [#allocation4], %s1454_s13, %s1454_s13, %s1455_s14  }
 0x43b   :  { %1449 = dma.done.wait [#allocation4], 4096  }
 0x43c   :  { %1450 = vsyncadd [#allocation4], 4294963200 }
 0x43d   :  { %1451 = dma.done.wait [#allocation9], 8192  }
 0x43e   :  { %1452 = vsyncadd [#allocation9], 4294959104 }
 0x43f   :  { %1202 = vsyncpa [#allocation3], 1 }
 0x440   :  { %1203 = vsyncpa [#allocation6], 1 }
 0x441   :  { %1204 = vsyncpa [#allocation4], 1 }
 0x442   :  { %1205 = vsyncpa [#allocation9], 1 }

</bundles_post_ra>
